<compile_context>
chip_gen: v7x
topology: tpu7x:2x2x1
jax: 0.10.0
libtpu: 0.0.40
codegen_flags: <defaults>
</compile_context>

<pallas_src>
import functools

import jax
import jax.numpy as jnp
from jax.experimental import pallas as pl
from jax.experimental.pallas import tpu as pltpu


def _him_kernel(
    x_ref, prior_ref,
    col_ref, ln2_ref, kvb_ref,
    qwT_ref, kw_ref, vw_ref, pwT_ref, mask_ref,
    o_ref,
    *, num_heads: int,
):
    f32, bf = jnp.float32, jnp.bfloat16
    eps = 1e-5

    bb, C, N = x_ref.shape                      # batches per step, channels, tokens
    Mp, E2 = prior_ref.shape[1], prior_ref.shape[2]
    dim = C
    HM = num_heads * Mp

    # ---- unpack packed small operands (3 tiny DMAs instead of 8) ----
    col = col_ref[...]                          # (dim, 4) f32
    ln1w, ln1b = col[:, 0:1], col[:, 1:2]       # (C, 1)
    q_bT, p_bT = col[:, 2:3], col[:, 3:4]       # (dim, 1); q bias pre-scaled
    ln2 = ln2_ref[...]                          # (2, E2)
    ln2w, ln2b = ln2[0:1, :], ln2[1:2, :]
    kvb = kvb_ref[...]                          # (2, dim)
    k_b, v_b = kvb[0:1, :], kvb[1:2, :]
    q_wT = qwT_ref[...]                         # (dim, C)  bf16, attention scale folded in
    k_w, v_w = kw_ref[...], vw_ref[...]         # (E2, dim) bf16
    p_wT = pwT_ref[...]                         # (dim, dim) bf16 (proj weight, transposed)
    maskK = mask_ref[...]                       # (HM, dim) f32 block-diagonal head mask

    # ---- LayerNorm statistics, batched once over the whole block (f32) ----
    Xf = x_ref[...].astype(f32)                               # (bb, C, N)
    mu = jnp.mean(Xf, axis=1, keepdims=True)                  # (bb, 1, N)
    ex2 = jnp.mean(Xf * Xf, axis=1, keepdims=True)
    rstd = jax.lax.rsqrt(ex2 - mu * mu + eps)                 # (bb, 1, N)

    P = prior_ref[...].astype(f32)                            # (bb, Mp, E2)
    mu_p = jnp.mean(P, axis=-1, keepdims=True)
    ex2_p = jnp.mean(P * P, axis=-1, keepdims=True)
    pn = (P - mu_p) * jax.lax.rsqrt(ex2_p - mu_p * mu_p + eps) * ln2w + ln2b

    # ---- batched, weight-shared K/V projections (one MXU call each) ----
    pn2 = pn.reshape(bb * Mp, E2).astype(bf)
    K_all = jnp.dot(pn2, k_w, preferred_element_type=f32) + k_b    # (bb*Mp, dim)
    V_all = jnp.dot(pn2, v_w, preferred_element_type=f32) + v_b    # (bb*Mp, dim)

    # ---- block-diagonal per-head operands + fused tiny projections (batched) ----
    K3 = K_all.reshape(bb, Mp, dim)
    V3 = V_all.reshape(bb, Mp, dim)
    Kbd = (jnp.concatenate([K3] * num_heads, axis=1) * maskK).reshape(bb * HM, dim)
    VbdT = (jnp.concatenate([V3] * num_heads, axis=1) * maskK).reshape(bb * HM, dim)

    # q fused into scores:   sT = (Kbd @ Wq_s^T) @ xn^T + Kbd @ bq_s^T
    Kq_all = jnp.dot(Kbd.astype(bf), q_wT,
                     preferred_element_type=f32).astype(bf)         # (bb*HM, C)
    kqb_all = jnp.dot(Kbd, q_bT)                                    # (bb*HM, 1) f32
    # proj fused into AV:    y^T = (Wp^T @ Vbd) @ attn^T + bp^T;  PV^T = Vbd^T @ Wp
    PV_cat = jax.lax.dot_general(                                   # (dim, bb*HM)
        p_wT, VbdT.astype(bf), (((1,), (1,)), ((), ())),
        preferred_element_type=f32).astype(bf)

    # ---- per-batch attention core: only 2 N-lane-wide matmuls + softmax (bb <= 8) ----
    for j in range(bb):
        x_j = x_ref[j].astype(f32)                                  # (C, N)
        xn_j = ((x_j - mu[j]) * rstd[j] * ln1w + ln1b).astype(bf)
        r = j * HM

        sT = jnp.dot(Kq_all[r:r + HM, :], xn_j,
                     preferred_element_type=f32) + kqb_all[r:r + HM, :]   # (HM, N)

        # per-head softmax over the Mp prior tokens, f32 throughout
        s3 = sT.reshape(num_heads, Mp, N)
        m = jnp.max(s3, axis=1, keepdims=True)                      # per-head, per-token max
        p3 = jnp.exp(s3 - m)
        den = jnp.sum(p3, axis=1, keepdims=True)                    # f32 denominators
        attnT = (p3 * pl.reciprocal(den, approx=True)).reshape(HM, N).astype(bf)

        yT = jnp.dot(PV_cat[:, r:r + HM], attnT,
                     preferred_element_type=f32) + p_bT             # (dim, N)

        o_ref[j] = (x_j + yT).astype(o_ref.dtype)                   # residual, lane-dense store


def him_forward(x_nchw, prior, params, *, num_heads, batch_block=None, n_block=None):
    """x_nchw: (B, C, H, W), prior: (B, M, embed_dim*2). Returns (B, C, H, W)."""
    B, C, H, W = x_nchw.shape
    N = H * W
    Mp, E2 = prior.shape[1], prior.shape[2]
    dim = C
    head_dim = dim // num_heads
    HM = num_heads * Mp
    scale = head_dim ** (-0.5)

    # Batch tiling: bounded (<= 8) so the in-kernel loop stays tiny and VMEM stays
    # small (~256 KiB per unit of batch_block, double-buffered), and >= 2 grid
    # steps whenever B >= 2 (both v7x TensorCores busy).
    if batch_block is None:
        cap = min(8, max(1, B // 2)) if B >= 2 else 1
        batch_block = 1
        for cand in range(min(cap, B), 0, -1):
            if B % cand == 0:
                batch_block = cand
                break
    assert B % batch_block == 0
    grid_b = B // batch_block

    # Token tiling: split N (128-lane tiles) only when needed to expose >= 2 grid
    # steps (B == 1); all reductions are over C or Mp, so an N split is exact.
    if n_block is None:
        n_block = N // 2 if (grid_b < 2 and N % 256 == 0) else N
    assert N % n_block == 0
    grid_n = N // n_block

    x_ct = x_nchw.reshape(B, C, N)      # channels-major tiles: pure reshape, no transpose

    bf = jnp.bfloat16
    f32 = jnp.float32
    # Weight prep (XLA-side, once): fold attention scale into q, split kv into k/v,
    # transpose into kernel-consumed forms, bf16 for MXU operands, pack 1-wide vectors.
    q_wT = (params["q_w"] * scale).T.astype(bf)                    # (dim, C)
    k_w = params["kv_w"][:, :dim].astype(bf)                       # (E2, dim)
    v_w = params["kv_w"][:, dim:].astype(bf)                       # (E2, dim)
    p_wT = params["proj_w"].T.astype(bf)                           # (dim, dim)
    colpack = jnp.stack(
        [params["ln1_w"].reshape(C), params["ln1_b"].reshape(C),
         (params["q_b"] * scale).reshape(dim), params["proj_b"].reshape(dim)],
        axis=1).astype(f32)                                        # (dim, 4)
    ln2pack = jnp.concatenate(
        [params["ln2_w"].reshape(1, E2), params["ln2_b"].reshape(1, E2)],
        axis=0).astype(f32)                                        # (2, E2)
    kvbpack = jnp.stack(
        [params["kv_b"].reshape(-1)[:dim], params["kv_b"].reshape(-1)[dim:]],
        axis=0).astype(f32)                                        # (2, dim)
    # Block-diagonal head-selection mask, built once outside the kernel.
    row_head = jnp.arange(HM) // Mp
    col_head = jnp.arange(dim) // head_dim
    maskK = (row_head[:, None] == col_head[None, :]).astype(f32)   # (HM, dim)

    kern = functools.partial(_him_kernel, num_heads=num_heads)

    def wspec(shape):
        n = len(shape)
        return pl.BlockSpec(shape, lambda i, j: (0,) * n)

    out = pl.pallas_call(
        kern,
        out_shape=jax.ShapeDtypeStruct((B, C, N), x_ct.dtype),
        grid=(grid_b, grid_n),
        in_specs=[
            pl.BlockSpec((batch_block, C, n_block), lambda i, j: (i, 0, j)),   # x
            pl.BlockSpec((batch_block, Mp, E2), lambda i, j: (i, 0, 0)),       # prior
            wspec((dim, 4)),      # ln1 w/b, scaled q bias, proj bias (columns)
            wspec((2, E2)),       # ln2 w/b
            wspec((2, dim)),      # k/v biases
            wspec((dim, C)),      # q weight^T (scaled)
            wspec((E2, dim)),     # k weight
            wspec((E2, dim)),     # v weight
            wspec((dim, dim)),    # proj weight^T
            wspec((HM, dim)),     # block-diag head mask
        ],
        out_specs=pl.BlockSpec((batch_block, C, n_block), lambda i, j: (i, 0, j)),
        compiler_params=pltpu.CompilerParams(
            dimension_semantics=("parallel", "parallel")),
    )(
        x_ct, prior,
        colpack, ln2pack, kvbpack,
        q_wT, k_w, v_w, p_wT, maskK,
    )

    return out.reshape(B, C, H, W)      # free reshape back to NCHW


def him_reference(x_nchw, prior, params, *, num_heads):
    """Pure-JAX f32 reference (mirrors the PyTorch forward)."""
    B, C, H, W = x_nchw.shape
    N = H * W
    dim = C
    head_dim = dim // num_heads
    scale = head_dim ** (-0.5)
    eps = 1e-5

    x = jnp.transpose(x_nchw, (0, 2, 3, 1)).reshape(B, N, C)

    mu = jnp.mean(x, -1, keepdims=True)
    var = jnp.mean((x - mu) ** 2, -1, keepdims=True)
    xn = (x - mu) / jnp.sqrt(var + eps) * params["ln1_w"][0] + params["ln1_b"][0]

    mu_p = jnp.mean(prior, -1, keepdims=True)
    var_p = jnp.mean((prior - mu_p) ** 2, -1, keepdims=True)
    pn = (prior - mu_p) / jnp.sqrt(var_p + eps) * params["ln2_w"][0] + params["ln2_b"][0]

    q = xn @ params["q_w"] + params["q_b"][0]
    kv = pn @ params["kv_w"] + params["kv_b"][0]
    k, v = kv[..., :dim], kv[..., dim:]

    def split_heads(t):
        return jnp.transpose(t.reshape(B, -1, num_heads, head_dim), (0, 2, 1, 3))

    qh, kh, vh = split_heads(q), split_heads(k), split_heads(v)
    attn = jnp.einsum("bhnc,bhmc->bhnm", qh, kh) * scale
    attn = jax.nn.softmax(attn, axis=-1)
    out = jnp.einsum("bhnm,bhmc->bhnc", attn, vh)
    out = jnp.transpose(out, (0, 2, 1, 3)).reshape(B, N, dim)
    out = out @ params["proj_w"] + params["proj_b"][0]
    x = x + out
    return jnp.transpose(x.reshape(B, H, W, C), (0, 3, 1, 2))


if __name__ == "__main__":
    # dim=C=32, num_heads=4 (head_dim=8), H=W=16 (N=256),
    # embed_dim=16 (prior channels = embed_dim*2 = 32), M=8 prior tokens.
    B, C, H, W = 2, 32, 16, 16
    num_heads = 4
    embed_dim = 16
    E2 = embed_dim * 2
    M = 8

    key = jax.random.PRNGKey(0)
    ks = jax.random.split(key, 12)

    x = jax.random.normal(ks[0], (B, C, H, W), jnp.float32)
    prior = jax.random.normal(ks[1], (B, M, E2), jnp.float32)

    def winit(k, shape, fan_in):
        return jax.random.uniform(k, shape, jnp.float32,
                                  -1.0 / jnp.sqrt(fan_in), 1.0 / jnp.sqrt(fan_in))

    params = {
        # LayerNorm params perturbed deterministically around torch defaults.
        "ln1_w": 1.0 + 0.1 * jax.random.normal(ks[2], (1, C), jnp.float32),
        "ln1_b": 0.1 * jax.random.normal(ks[3], (1, C), jnp.float32),
        "ln2_w": 1.0 + 0.1 * jax.random.normal(ks[4], (1, E2), jnp.float32),
        "ln2_b": 0.1 * jax.random.normal(ks[5], (1, E2), jnp.float32),
        # Linear weights stored as (in_features, out_features) == torch weight.T
        "q_w": winit(ks[6], (C, C), C),
        "q_b": winit(ks[7], (1, C), C),
        "kv_w": winit(ks[8], (E2, 2 * C), E2),
        "kv_b": winit(ks[9], (1, 2 * C), E2),
        "proj_w": winit(ks[10], (C, C), C),
        "proj_b": winit(ks[11], (1, C), C),
    }

    y = jax.block_until_ready(him_forward(x, prior, params, num_heads=num_heads))
    y_ref = jax.block_until_ready(him_reference(x, prior, params, num_heads=num_heads))

    assert y.shape == (B, C, H, W)
    max_err = float(jnp.max(jnp.abs(y - y_ref)))
    # bf16 MXU operands (f32 accumulation) bound the error; softmax math is f32
    # with per-head stabilization, so the observed error is well inside this.
    assert jnp.allclose(y, y_ref, atol=2e-2, rtol=2e-2), max_err

    print("KERNEL_OK")
</pallas_src>

<mosaic_0001>
module attributes {stable_mosaic.version = 11 : i64} {
  func.func @_him_kernel(%arg0: i32, %arg1: i32, %arg2: memref<1x32x256xf32, #tpu.memory_space<vmem>>, %arg3: memref<1x8x32xf32, #tpu.memory_space<vmem>>, %arg4: memref<32x4xf32, #tpu.memory_space<vmem>>, %arg5: memref<2x32xf32, #tpu.memory_space<vmem>>, %arg6: memref<2x32xf32, #tpu.memory_space<vmem>>, %arg7: memref<32x32xbf16, #tpu.memory_space<vmem>>, %arg8: memref<32x32xbf16, #tpu.memory_space<vmem>>, %arg9: memref<32x32xbf16, #tpu.memory_space<vmem>>, %arg10: memref<32x32xbf16, #tpu.memory_space<vmem>>, %arg11: memref<32x32xf32, #tpu.memory_space<vmem>>, %arg12: memref<1x32x256xf32, #tpu.memory_space<vmem>>) attributes {dimension_semantics = [#tpu.dimension_semantics<parallel>, #tpu.dimension_semantics<parallel>], iteration_bounds = array<i64: 2, 1>, scalar_prefetch = 0 : i64, scratch_operands = 0 : i64, tpu.core_type = #tpu.core_type<tc>, window_params = [{transform_indices = @transform_0, window_bounds = array<i64: 1, 32, 256>}, {transform_indices = @transform_1, window_bounds = array<i64: 1, 8, 32>}, {pipeline_mode = #tpu.pipeline_mode<synchronous>, transform_indices = @transform_2, window_bounds = array<i64: 32, 4>}, {pipeline_mode = #tpu.pipeline_mode<synchronous>, transform_indices = @transform_3, window_bounds = array<i64: 2, 32>}, {pipeline_mode = #tpu.pipeline_mode<synchronous>, transform_indices = @transform_4, window_bounds = array<i64: 2, 32>}, {pipeline_mode = #tpu.pipeline_mode<synchronous>, transform_indices = @transform_5, window_bounds = array<i64: 32, 32>}, {pipeline_mode = #tpu.pipeline_mode<synchronous>, transform_indices = @transform_6, window_bounds = array<i64: 32, 32>}, {pipeline_mode = #tpu.pipeline_mode<synchronous>, transform_indices = @transform_7, window_bounds = array<i64: 32, 32>}, {pipeline_mode = #tpu.pipeline_mode<synchronous>, transform_indices = @transform_8, window_bounds = array<i64: 32, 32>}, {pipeline_mode = #tpu.pipeline_mode<synchronous>, transform_indices = @transform_9, window_bounds = array<i64: 32, 32>}, {transform_indices = @transform_10, window_bounds = array<i64: 1, 32, 256>}]} {
    %c0 = arith.constant 0 : index
    %c0_0 = arith.constant 0 : index
    %0 = vector.load %arg4[%c0, %c0_0] : memref<32x4xf32, #tpu.memory_space<vmem>>, vector<32x4xf32>
    %1 = vector.extract_strided_slice %0 {offsets = [0, 0], sizes = [32, 1], strides = [1, 1]} : vector<32x4xf32> to vector<32x1xf32>
    %2 = vector.extract_strided_slice %0 {offsets = [0, 1], sizes = [32, 1], strides = [1, 1]} : vector<32x4xf32> to vector<32x1xf32>
    %3 = vector.extract_strided_slice %0 {offsets = [0, 2], sizes = [32, 1], strides = [1, 1]} : vector<32x4xf32> to vector<32x1xf32>
    %4 = vector.extract_strided_slice %0 {offsets = [0, 3], sizes = [32, 1], strides = [1, 1]} : vector<32x4xf32> to vector<32x1xf32>
    %c0_1 = arith.constant 0 : index
    %c0_2 = arith.constant 0 : index
    %5 = vector.load %arg5[%c0_1, %c0_2] : memref<2x32xf32, #tpu.memory_space<vmem>>, vector<2x32xf32>
    %6 = vector.extract_strided_slice %5 {offsets = [0, 0], sizes = [1, 32], strides = [1, 1]} : vector<2x32xf32> to vector<1x32xf32>
    %7 = vector.extract_strided_slice %5 {offsets = [1, 0], sizes = [1, 32], strides = [1, 1]} : vector<2x32xf32> to vector<1x32xf32>
    %c0_3 = arith.constant 0 : index
    %c0_4 = arith.constant 0 : index
    %8 = vector.load %arg6[%c0_3, %c0_4] : memref<2x32xf32, #tpu.memory_space<vmem>>, vector<2x32xf32>
    %9 = vector.extract_strided_slice %8 {offsets = [0, 0], sizes = [1, 32], strides = [1, 1]} : vector<2x32xf32> to vector<1x32xf32>
    %10 = vector.extract_strided_slice %8 {offsets = [1, 0], sizes = [1, 32], strides = [1, 1]} : vector<2x32xf32> to vector<1x32xf32>
    %c0_5 = arith.constant 0 : index
    %c0_6 = arith.constant 0 : index
    %11 = vector.load %arg7[%c0_5, %c0_6] : memref<32x32xbf16, #tpu.memory_space<vmem>>, vector<32x32xbf16>
    %c0_7 = arith.constant 0 : index
    %c0_8 = arith.constant 0 : index
    %12 = vector.load %arg8[%c0_7, %c0_8] : memref<32x32xbf16, #tpu.memory_space<vmem>>, vector<32x32xbf16>
    %c0_9 = arith.constant 0 : index
    %c0_10 = arith.constant 0 : index
    %13 = vector.load %arg9[%c0_9, %c0_10] : memref<32x32xbf16, #tpu.memory_space<vmem>>, vector<32x32xbf16>
    %c0_11 = arith.constant 0 : index
    %c0_12 = arith.constant 0 : index
    %14 = vector.load %arg10[%c0_11, %c0_12] : memref<32x32xbf16, #tpu.memory_space<vmem>>, vector<32x32xbf16>
    %c0_13 = arith.constant 0 : index
    %c0_14 = arith.constant 0 : index
    %15 = vector.load %arg11[%c0_13, %c0_14] : memref<32x32xf32, #tpu.memory_space<vmem>>, vector<32x32xf32>
    %c0_15 = arith.constant 0 : index
    %c0_16 = arith.constant 0 : index
    %c0_17 = arith.constant 0 : index
    %16 = vector.load %arg2[%c0_15, %c0_16, %c0_17] : memref<1x32x256xf32, #tpu.memory_space<vmem>>, vector<1x32x256xf32>
    %cst = arith.constant dense<0.000000e+00> : vector<1x256xf32>
    %17 = vector.multi_reduction <add>, %16, %cst [1] : vector<1x32x256xf32> to vector<1x256xf32>
    %18 = vector.shape_cast %17 : vector<1x256xf32> to vector<1x1x256xf32>
    %cst_18 = arith.constant 3.200000e+01 : f32
    %19 = vector.broadcast %cst_18 : f32 to vector<1x1x256xf32>
    %20 = arith.divf %18, %19 : vector<1x1x256xf32>
    %21 = arith.mulf %16, %16 : vector<1x32x256xf32>
    %cst_19 = arith.constant dense<0.000000e+00> : vector<1x256xf32>
    %22 = vector.multi_reduction <add>, %21, %cst_19 [1] : vector<1x32x256xf32> to vector<1x256xf32>
    %23 = vector.shape_cast %22 : vector<1x256xf32> to vector<1x1x256xf32>
    %cst_20 = arith.constant 3.200000e+01 : f32
    %24 = vector.broadcast %cst_20 : f32 to vector<1x1x256xf32>
    %25 = arith.divf %23, %24 : vector<1x1x256xf32>
    %26 = arith.mulf %20, %20 : vector<1x1x256xf32>
    %27 = arith.subf %25, %26 : vector<1x1x256xf32>
    %cst_21 = arith.constant 9.99999974E-6 : f32
    %28 = vector.broadcast %cst_21 : f32 to vector<1x1x256xf32>
    %29 = arith.addf %27, %28 : vector<1x1x256xf32>
    %30 = math.rsqrt %29 : vector<1x1x256xf32>
    %c0_22 = arith.constant 0 : index
    %c0_23 = arith.constant 0 : index
    %c0_24 = arith.constant 0 : index
    %31 = vector.load %arg3[%c0_22, %c0_23, %c0_24] : memref<1x8x32xf32, #tpu.memory_space<vmem>>, vector<1x8x32xf32>
    %cst_25 = arith.constant dense<0.000000e+00> : vector<1x8xf32>
    %32 = vector.multi_reduction <add>, %31, %cst_25 [2] : vector<1x8x32xf32> to vector<1x8xf32>
    %33 = vector.shape_cast %32 : vector<1x8xf32> to vector<1x8x1xf32>
    %cst_26 = arith.constant 3.200000e+01 : f32
    %34 = vector.broadcast %cst_26 : f32 to vector<1x8x1xf32>
    %35 = arith.divf %33, %34 : vector<1x8x1xf32>
    %36 = arith.mulf %31, %31 : vector<1x8x32xf32>
    %cst_27 = arith.constant dense<0.000000e+00> : vector<1x8xf32>
    %37 = vector.multi_reduction <add>, %36, %cst_27 [2] : vector<1x8x32xf32> to vector<1x8xf32>
    %38 = vector.shape_cast %37 : vector<1x8xf32> to vector<1x8x1xf32>
    %cst_28 = arith.constant 3.200000e+01 : f32
    %39 = vector.broadcast %cst_28 : f32 to vector<1x8x1xf32>
    %40 = arith.divf %38, %39 : vector<1x8x1xf32>
    %41 = vector.broadcast %35 : vector<1x8x1xf32> to vector<1x8x32xf32>
    %42 = arith.subf %31, %41 : vector<1x8x32xf32>
    %43 = arith.mulf %35, %35 : vector<1x8x1xf32>
    %44 = arith.subf %40, %43 : vector<1x8x1xf32>
    %cst_29 = arith.constant 9.99999974E-6 : f32
    %45 = vector.broadcast %cst_29 : f32 to vector<1x8x1xf32>
    %46 = arith.addf %44, %45 : vector<1x8x1xf32>
    %47 = math.rsqrt %46 : vector<1x8x1xf32>
    %48 = vector.broadcast %47 : vector<1x8x1xf32> to vector<1x8x32xf32>
    %49 = arith.mulf %42, %48 : vector<1x8x32xf32>
    %50 = vector.shape_cast %6 : vector<1x32xf32> to vector<1x1x32xf32>
    %51 = vector.broadcast %50 : vector<1x1x32xf32> to vector<1x8x32xf32>
    %52 = arith.mulf %49, %51 : vector<1x8x32xf32>
    %53 = vector.shape_cast %7 : vector<1x32xf32> to vector<1x1x32xf32>
    %54 = vector.broadcast %53 : vector<1x1x32xf32> to vector<1x8x32xf32>
    %55 = arith.addf %52, %54 : vector<1x8x32xf32>
    %56 = vector.shape_cast %55 : vector<1x8x32xf32> to vector<8x32xf32>
    %57 = arith.truncf %56 : vector<8x32xf32> to vector<8x32xbf16>
    %cst_30 = arith.constant dense<0.000000e+00> : vector<8x32xf32>
    %58 = tpu.matmul %57, %12, %cst_30 {dimension_numbers = #tpu.dot_dimension_numbers<[1], [0], [0], [1], [0, 0, 1, 1], [], []>} : vector<8x32xbf16>, vector<32x32xbf16>, vector<8x32xf32> -> vector<8x32xf32>
    %59 = vector.broadcast %9 : vector<1x32xf32> to vector<8x32xf32>
    %60 = arith.addf %58, %59 : vector<8x32xf32>
    %cst_31 = arith.constant dense<0.000000e+00> : vector<8x32xf32>
    %61 = tpu.matmul %57, %13, %cst_31 {dimension_numbers = #tpu.dot_dimension_numbers<[1], [0], [0], [1], [0, 0, 1, 1], [], []>} : vector<8x32xbf16>, vector<32x32xbf16>, vector<8x32xf32> -> vector<8x32xf32>
    %62 = vector.broadcast %10 : vector<1x32xf32> to vector<8x32xf32>
    %63 = arith.addf %61, %62 : vector<8x32xf32>
    %64 = vector.shape_cast %60 : vector<8x32xf32> to vector<1x8x32xf32>
    %65 = vector.shape_cast %63 : vector<8x32xf32> to vector<1x8x32xf32>
    %66 = tpu.concatenate %64, %64, %64, %64 in 1 : vector<1x8x32xf32>, vector<1x8x32xf32>, vector<1x8x32xf32>, vector<1x8x32xf32> -> vector<1x32x32xf32>
    %67 = vector.shape_cast %15 : vector<32x32xf32> to vector<1x32x32xf32>
    %68 = arith.mulf %66, %67 : vector<1x32x32xf32>
    %69 = vector.shape_cast %68 : vector<1x32x32xf32> to vector<32x32xf32>
    %70 = tpu.concatenate %65, %65, %65, %65 in 1 : vector<1x8x32xf32>, vector<1x8x32xf32>, vector<1x8x32xf32>, vector<1x8x32xf32> -> vector<1x32x32xf32>
    %71 = vector.shape_cast %15 : vector<32x32xf32> to vector<1x32x32xf32>
    %72 = arith.mulf %70, %71 : vector<1x32x32xf32>
    %73 = vector.shape_cast %72 : vector<1x32x32xf32> to vector<32x32xf32>
    %74 = arith.truncf %69 : vector<32x32xf32> to vector<32x32xbf16>
    %cst_32 = arith.constant dense<0.000000e+00> : vector<32x32xf32>
    %75 = tpu.matmul %74, %11, %cst_32 {dimension_numbers = #tpu.dot_dimension_numbers<[1], [0], [0], [1], [0, 0, 1, 1], [], []>} : vector<32x32xbf16>, vector<32x32xbf16>, vector<32x32xf32> -> vector<32x32xf32>
    %76 = arith.truncf %75 : vector<32x32xf32> to vector<32x32xbf16>
    %cst_33 = arith.constant dense<0.000000e+00> : vector<32x1xf32>
    %77 = tpu.matmul %69, %3, %cst_33 {dimension_numbers = #tpu.dot_dimension_numbers<[1], [0], [0], [1], [0, 0, 1, 1], [], []>} : vector<32x32xf32>, vector<32x1xf32>, vector<32x1xf32> -> vector<32x1xf32>
    %78 = arith.truncf %73 : vector<32x32xf32> to vector<32x32xbf16>
    %cst_34 = arith.constant dense<0.000000e+00> : vector<32x32xf32>
    %79 = tpu.matmul %14, %78, %cst_34 {dimension_numbers = #tpu.dot_dimension_numbers<[1], [1], [0], [0], [0, 0, 1, 0], [], []>} : vector<32x32xbf16>, vector<32x32xbf16>, vector<32x32xf32> -> vector<32x32xf32>
    %80 = arith.truncf %79 : vector<32x32xf32> to vector<32x32xbf16>
    %c0_35 = arith.constant 0 : index
    %c0_36 = arith.constant 0 : index
    %c0_37 = arith.constant 0 : index
    %81 = vector.load %arg2[%c0_35, %c0_36, %c0_37] : memref<1x32x256xf32, #tpu.memory_space<vmem>>, vector<1x32x256xf32>
    %82 = vector.shape_cast %81 : vector<1x32x256xf32> to vector<32x256xf32>
    %83 = vector.shape_cast %20 : vector<1x1x256xf32> to vector<1x256xf32>
    %84 = vector.broadcast %83 : vector<1x256xf32> to vector<32x256xf32>
    %85 = arith.subf %82, %84 : vector<32x256xf32>
    %86 = vector.shape_cast %30 : vector<1x1x256xf32> to vector<1x256xf32>
    %87 = vector.broadcast %86 : vector<1x256xf32> to vector<32x256xf32>
    %88 = arith.mulf %85, %87 : vector<32x256xf32>
    %89 = vector.broadcast %1 : vector<32x1xf32> to vector<32x256xf32>
    %90 = arith.mulf %88, %89 : vector<32x256xf32>
    %91 = vector.broadcast %2 : vector<32x1xf32> to vector<32x256xf32>
    %92 = arith.addf %90, %91 : vector<32x256xf32>
    %93 = arith.truncf %92 : vector<32x256xf32> to vector<32x256xbf16>
    %cst_38 = arith.constant dense<0.000000e+00> : vector<32x256xf32>
    %94 = tpu.matmul %76, %93, %cst_38 {dimension_numbers = #tpu.dot_dimension_numbers<[1], [0], [0], [1], [0, 0, 1, 1], [], []>} : vector<32x32xbf16>, vector<32x256xbf16>, vector<32x256xf32> -> vector<32x256xf32>
    %95 = vector.broadcast %77 : vector<32x1xf32> to vector<32x256xf32>
    %96 = arith.addf %94, %95 : vector<32x256xf32>
    %97 = vector.shape_cast %96 : vector<32x256xf32> to vector<4x8x256xf32>
    %cst_39 = arith.constant dense<0xFF800000> : vector<4x256xf32>
    %98 = vector.multi_reduction <maximumf>, %97, %cst_39 [1] : vector<4x8x256xf32> to vector<4x256xf32>
    %99 = vector.shape_cast %98 : vector<4x256xf32> to vector<4x1x256xf32>
    %100 = vector.broadcast %99 : vector<4x1x256xf32> to vector<4x8x256xf32>
    %101 = arith.subf %97, %100 : vector<4x8x256xf32>
    %102 = math.exp %101 : vector<4x8x256xf32>
    %cst_40 = arith.constant dense<0.000000e+00> : vector<4x256xf32>
    %103 = vector.multi_reduction <add>, %102, %cst_40 [1] : vector<4x8x256xf32> to vector<4x256xf32>
    %104 = vector.shape_cast %103 : vector<4x256xf32> to vector<4x1x256xf32>
    %105 = tpu.reciprocal %104 {approx = true} : vector<4x1x256xf32> -> vector<4x1x256xf32>
    %106 = vector.broadcast %105 : vector<4x1x256xf32> to vector<4x8x256xf32>
    %107 = arith.mulf %102, %106 : vector<4x8x256xf32>
    %108 = vector.shape_cast %107 : vector<4x8x256xf32> to vector<32x256xf32>
    %109 = arith.truncf %108 : vector<32x256xf32> to vector<32x256xbf16>
    %cst_41 = arith.constant dense<0.000000e+00> : vector<32x256xf32>
    %110 = tpu.matmul %80, %109, %cst_41 {dimension_numbers = #tpu.dot_dimension_numbers<[1], [0], [0], [1], [0, 0, 1, 1], [], []>} : vector<32x32xbf16>, vector<32x256xbf16>, vector<32x256xf32> -> vector<32x256xf32>
    %111 = vector.broadcast %4 : vector<32x1xf32> to vector<32x256xf32>
    %112 = arith.addf %110, %111 : vector<32x256xf32>
    %113 = arith.addf %82, %112 : vector<32x256xf32>
    %c0_42 = arith.constant 0 : index
    %c0_43 = arith.constant 0 : index
    %c0_44 = arith.constant 0 : index
    %114 = vector.load %arg12[%c0_42, %c0_43, %c0_44] : memref<1x32x256xf32, #tpu.memory_space<vmem>>, vector<1x32x256xf32>
    %115 = vector.shape_cast %114 : vector<1x32x256xf32> to vector<32x256xf32>
    %116 = vector.shape_cast %113 : vector<32x256xf32> to vector<1x32x256xf32>
    tpu.vector_store %arg12[%c0_42, %c0_43, %c0_44], %116 {strides = array<i32>} : memref<1x32x256xf32, #tpu.memory_space<vmem>>, vector<1x32x256xf32>,
    return
  }
  func.func @transform_0(%arg0: i32, %arg1: i32) -> (i32, i32, i32) {
    %c0_i32 = arith.constant 0 : i32
    %c0_i32_0 = arith.constant 0 : i32
    return %arg0, %c0_i32, %arg1 : i32, i32, i32
  }
  func.func @transform_1(%arg0: i32, %arg1: i32) -> (i32, i32, i32) {
    %c0_i32 = arith.constant 0 : i32
    %c0_i32_0 = arith.constant 0 : i32
    %c0_i32_1 = arith.constant 0 : i32
    return %arg0, %c0_i32, %c0_i32_0 : i32, i32, i32
  }
  func.func @transform_2(%arg0: i32, %arg1: i32) -> (i32, i32) {
    %c0_i32 = arith.constant 0 : i32
    %c0_i32_0 = arith.constant 0 : i32
    %c0_i32_1 = arith.constant 0 : i32
    return %c0_i32, %c0_i32_0 : i32, i32
  }
  func.func @transform_3(%arg0: i32, %arg1: i32) -> (i32, i32) {
    %c0_i32 = arith.constant 0 : i32
    %c0_i32_0 = arith.constant 0 : i32
    %c0_i32_1 = arith.constant 0 : i32
    return %c0_i32, %c0_i32_0 : i32, i32
  }
  func.func @transform_4(%arg0: i32, %arg1: i32) -> (i32, i32) {
    %c0_i32 = arith.constant 0 : i32
    %c0_i32_0 = arith.constant 0 : i32
    %c0_i32_1 = arith.constant 0 : i32
    return %c0_i32, %c0_i32_0 : i32, i32
  }
  func.func @transform_5(%arg0: i32, %arg1: i32) -> (i32, i32) {
    %c0_i32 = arith.constant 0 : i32
    %c0_i32_0 = arith.constant 0 : i32
    %c0_i32_1 = arith.constant 0 : i32
    return %c0_i32, %c0_i32_0 : i32, i32
  }
  func.func @transform_6(%arg0: i32, %arg1: i32) -> (i32, i32) {
    %c0_i32 = arith.constant 0 : i32
    %c0_i32_0 = arith.constant 0 : i32
    %c0_i32_1 = arith.constant 0 : i32
    return %c0_i32, %c0_i32_0 : i32, i32
  }
  func.func @transform_7(%arg0: i32, %arg1: i32) -> (i32, i32) {
    %c0_i32 = arith.constant 0 : i32
    %c0_i32_0 = arith.constant 0 : i32
    %c0_i32_1 = arith.constant 0 : i32
    return %c0_i32, %c0_i32_0 : i32, i32
  }
  func.func @transform_8(%arg0: i32, %arg1: i32) -> (i32, i32) {
    %c0_i32 = arith.constant 0 : i32
    %c0_i32_0 = arith.constant 0 : i32
    %c0_i32_1 = arith.constant 0 : i32
    return %c0_i32, %c0_i32_0 : i32, i32
  }
  func.func @transform_9(%arg0: i32, %arg1: i32) -> (i32, i32) {
    %c0_i32 = arith.constant 0 : i32
    %c0_i32_0 = arith.constant 0 : i32
    %c0_i32_1 = arith.constant 0 : i32
    return %c0_i32, %c0_i32_0 : i32, i32
  }
  func.func @transform_10(%arg0: i32, %arg1: i32) -> (i32, i32, i32) {
    %c0_i32 = arith.constant 0 : i32
    %c0_i32_0 = arith.constant 0 : i32
    return %arg0, %c0_i32, %arg1 : i32, i32, i32
  }
}

</mosaic_0001>

<bundles_post_ra>
// kernel: tpu_custom_call.1
= control target key start
LH: loop header
LB: loop body
LE: loop exit
PB: predicated region body
PF: predicated region fallthrough
CT: control target
= control target key end

     0   :  { %s2654_s0 = inlined_call_operand.hbm [shape: f32[2,32,256], index: 0, kind: input, shape index: {}]   ;;  %s2655_s1 = inlined_call_operand.vmem [shape: f32[2,8,32], index: 1, kind: input, shape index: {}]   ;;  %s2656_s2 = inlined_call_operand.vmem [shape: f32[32,4], index: 2, kind: input, shape index: {}]   ;;  %s2657_s3 = inlined_call_operand.vmem [shape: f32[2,32], index: 3, kind: input, shape index: {}]   ;;  %s2658_s4 = inlined_call_operand.hbm [shape: f32[2,32], index: 4, kind: input, shape index: {}]   ;;  %s2659_s5 = inlined_call_operand.hbm [shape: bf16[32,32], index: 5, kind: input, shape index: {}]   ;;  %s2660_s6 = inlined_call_operand.hbm [shape: bf16[32,32], index: 6, kind: input, shape index: {}]   ;;  %s2661_s7 = inlined_call_operand.hbm [shape: bf16[32,32], index: 7, kind: input, shape index: {}]   ;;  %s2662_s8 = inlined_call_operand.vmem [shape: bf16[32,32], index: 8, kind: input, shape index: {}]   ;;  %s2663_s9 = inlined_call_operand.vmem [shape: f32[32,32], index: 9, kind: input, shape index: {}]   ;;  %s2664_s10 = inlined_call_operand.hbm [shape: f32[2,32,256], index: 10, kind: output, shape index: {}]  }
   0x1   :  { %2674 = sst [smem:[#allocation18_spill]] %s2658_s4 }
   0x2   :  { %2675 = sst [smem:[#allocation19_spill]] %s2660_s6 }
   0x3   :  { %2676 = sst [smem:[#allocation20_spill]] %s2662_s8 }
   0x4   :  { %2677 = sst [smem:[#allocation21_spill]] %s2663_s9 }
   0x5   :  { %2678 = sst [smem:[#allocation22_spill]] %s2664_s10 }
   0x6   :  { %15 = vsyncpa [#allocation3], 0 }
   0x7   :  { %17 = vsyncpa [#allocation3 + $0x1], 0 }
   0x8   :  { %18 = vsyncpa [#allocation6], 0 }
   0x9   :  { %19 = vsyncpa [#allocation9], 0 }
   0xa   :  { %20 = vsyncpa [#allocation4], 0 }
   0xb   :  { %22 = vsyncpa [#allocation4 + $0x1], 0  ;;  %s2116_s13 = smov 0   ;;  %s2118_s14 = smov 0  }
   0xc   :  { %s2120_s15 = smov 0   ;;  %s2122_s16 = smov 0  }
   0xd   :  { %s2124_s17 = smov 0   ;;  %s2126_s18 = smov 0  }
   0xe LB: > { %2679 = sst [smem:[#allocation16_spill]] %s2021_s13  ;;  %s1504_s19 = sadd.s32 4294967295, %s2041_s18   ;;  %s2041_s18 = sphi %s2126_s18, %s28_s18   ;;  %s2037_s17 = sphi %s2124_s17, %s2707_s17   ;;  %s2033_s16 = sphi %s2122_s16, %s2706_s16   ;;  %s2029_s15 = sphi %s2120_s15, %s2705_s15   ;;  %s2025_s14 = sphi %s2118_s14, %s2704_s14   ;;  %s2021_s13 = sphi %s2116_s13, %s2703_s13  }
   0xf   : > { %s1505_s20 = sadd.s32 4294967294, %s2041_s18   ;;  %p62_p0 = scmp.ne.s32.totalorder %s2025_s14, %s2021_s13 }
  0x10   : > { %p2150_p1 = scmp.eq.s32.totalorder %s1504_s19, 0  ;;  %p2154_p2 = scmp.eq.s32.totalorder %s1504_s19, 1 }
  0x11   : > { %p288_p3 = scmp.eq.s32.totalorder %s1505_s20, 1  ;;  %p1506_p5 = scmp.ge.s32.totalorder %s2041_s18, 1 }
  0x12   : > { %s2680_s21 = scalar_select %p2150_p1, 1, 0 }
  0x13   : > { %s2681_s22 = scalar_select %p2154_p2, 1, 0 }
  0x14   : > { %p2160_p4 = por %p2150_p1, %p62_p0  ;;  %p2165_p6 = por %p288_p3, %p62_p0 }
  0x15   : > { %p295_p7 = scmp.lt.s32.totalorder %s2041_s18, 3  ;;  %s2043_s26 = smov [#allocation5]  }
  0x16   : > { %s2682_s23 = scalar_select %p2160_p4, 1, 0 }
  0x17   : > { %s2683_s24 = scalar_select %p2165_p6, 1, 0 }
  0x18   : > { %p2170_p8 = pnand %p1506_p5, %p295_p7  ;;  %s314_s27 = sshll.u32 %s2043_s26, 4  ;;  %s315_s27 = int_to_ptr.vmem [resolvable:$true] %s314_s27 }
  0x19   : > { %2684 = sst [smem:[#allocation17_spill]] %s2683_s24  ;;  %s2044_s29 = smov [#allocation8]  }
  0x1a   : > { %s2685_s25 = scalar_select %p2170_p8, 1, 0 }
  0x1b   : > { %p1650_p10 = pneg %p2170_p8  ;;  %s337_s30 = sshll.u32 %s2044_s29, 4  ;;  %s2183_s30 = int_to_ptr.vmem [resolvable:$true] %s337_s30 }
  0x1c   : > { %s2045_s11 = smov [#allocation7]   ;;  %s2687_s4 = sld [smem:[#allocation18_spill]] }
  0x1d   : > { %p2179_p11 = pnand %p1650_p10, %p2150_p1  ;;  %s2185_s12 = sshll.u32 %s2045_s11, 4  ;;  %s325_s12 = int_to_ptr.vmem [resolvable:$true] %s2185_s12 }
  0x1f   : > { %p2195_p13 = pneg %p2179_p11 }
  0x22   : > { %s1809_s26 = scalar_lea.hbm %s2687_s4, 32 }
  0x23   : > { %p1810_p12 = scmp.ne.s32.totalorder %s2687_s4, %s1809_s26  ;;  %p1816_p5 = scmp.lt.u32.totalorder %s1809_s26, %s2687_s4 }
  0x25   : > { %p1812_p0 = pnand %p2195_p13, %p1810_p12 }
  0x27   : > { %p1813_p3 = pneg %p1812_p0 }
  0x29   : > { %p1818_p7 = pnand %p1816_p5, %p1813_p3 }
  0x2b   : > { %1821 = shalt.err (!%p1818_p7)
}
  0x2c   : > { %s1822_s19 = scalar_lea.vmem %s315_s27, 32  ;;  %p1830_p1 = scmp.lt.s32.totalorder %s315_s27, %s315_s27 }
  0x2d   : > { %p1823_p10 = scmp.ne.s32.totalorder %s315_s27, %s1822_s19  ;;  %p1831_p4 = scmp.lt.s32.totalorder %s1822_s19, %s1822_s19 }
  0x2f   : > { %p1825_p9 = pnand %p1823_p10, %p2195_p13  ;;  %p1832_p8 = por %p1831_p4, %p1830_p1 }
  0x31   : > { %p1826_p6 = pneg %p1825_p9 }
  0x33   : > { %p1833_p2 = pnand %p1832_p8, %p1826_p6 }
  0x35   : > { %1836 = shalt.err (!%p1833_p2)
}
  0x36   : > { %1653 = dma.hbm_to_vmem [thread:$0]  (!%p2179_p11), %s2687_s4, 32, %s315_s27, [#allocation6]  }
  0x37   : > { %s2689_s6 = sld [smem:[#allocation19_spill]] }
  0x3d   : > { %s1837_s29 = scalar_lea.hbm %s2689_s6, 256 }
  0x3e   : > { %p1838_p9 = scmp.ne.s32.totalorder %s2689_s6, %s1837_s29  ;;  %p1844_p2 = scmp.lt.u32.totalorder %s1837_s29, %s2689_s6 }
  0x40   : > { %p1840_p12 = pnand %p1838_p9, %p2195_p13 }
  0x42   : > { %p1841_p1 = pneg %p1840_p12 }
  0x44   : > { %p1846_p4 = pnand %p1844_p2, %p1841_p1 }
  0x46   : > { %1849 = shalt.err (!%p1846_p4)
}
  0x47   : > { %s1850_s27 = scalar_lea.vmem %s2183_s30, 256  ;;  %p1858_p3 = scmp.lt.s32.totalorder %s2183_s30, %s2183_s30 }
  0x48   : > { %p1851_p6 = scmp.ne.s32.totalorder %s2183_s30, %s1850_s27  ;;  %p1859_p5 = scmp.lt.s32.totalorder %s1850_s27, %s1850_s27 }
  0x4a   : > { %p1853_p8 = pnand %p1851_p6, %p2195_p13  ;;  %p1860_p7 = por %p1859_p5, %p1858_p3 }
  0x4c   : > { %p1854_p0 = pneg %p1853_p8 }
  0x4e   : > { %p1861_p10 = pnand %p1860_p7, %p1854_p0 }
  0x50   : > { %1864 = shalt.err (!%p1861_p10)
}
  0x51   : > { %s2046_s8 = smov 64   ;;  %s2047_s9 = smov 4  }
  0x52   : > { %1659 = dma.hbm_to_vmem [thread:$0]  (!%p2179_p11), %s2689_s6, 256, %s2183_s30, [#allocation9], %s2046_s8, %s2046_s8, %s2047_s9  }
  0x53   : > { %s1865_s29 = scalar_lea.hbm %s2659_s5, 256 }
  0x54   : > { %p1866_p9 = scmp.ne.s32.totalorder %s2659_s5, %s1865_s29  ;;  %p1872_p2 = scmp.lt.u32.totalorder %s1865_s29, %s2659_s5 }
  0x56   : > { %p1868_p12 = pnand %p1866_p9, %p2195_p13 }
  0x58   : > { %p1869_p1 = pneg %p1868_p12 }
  0x5a   : > { %p1874_p4 = pnand %p1872_p2, %p1869_p1 }
  0x5c   : > { %1877 = shalt.err (!%p1874_p4)
}
  0x5d   : > { %s1878_s13 = scalar_lea.vmem %s325_s12, 256  ;;  %p1886_p3 = scmp.lt.s32.totalorder %s325_s12, %s325_s12 }
  0x5e   : > { %p1879_p6 = scmp.ne.s32.totalorder %s325_s12, %s1878_s13  ;;  %p1887_p5 = scmp.lt.s32.totalorder %s1878_s13, %s1878_s13 }
  0x60   : > { %p1881_p8 = pnand %p1879_p6, %p2195_p13  ;;  %p1888_p7 = por %p1887_p5, %p1886_p3 }
  0x62   : > { %p1882_p0 = pneg %p1881_p8 }
  0x64   : > { %p1889_p10 = pnand %p1888_p7, %p1882_p0 }
  0x66   : > { %1892 = shalt.err (!%p1889_p10)
}
  0x67   : > { %1656 = dma.hbm_to_vmem [thread:$0]  (!%p2179_p11), %s2659_s5, 256, %s325_s12, [#allocation6], %s2046_s8, %s2046_s8, %s2047_s9  }
  0x68   : > { %s2048_s24 = smov [#allocation10]   ;;  %s1893_s11 = scalar_lea.hbm %s2661_s7, 256 }
  0x69   : > { %s350_s20 = sshll.u32 %s2048_s24, 4  ;;  %p1894_p9 = scmp.ne.s32.totalorder %s2661_s7, %s1893_s11  ;;  %s351_s20 = int_to_ptr.vmem [resolvable:$true] %s350_s20 }
  0x6a   : > { %p1900_p2 = scmp.lt.u32.totalorder %s1893_s11, %s2661_s7 }
  0x6b   : > { %p1896_p12 = pnand %p1894_p9, %p2195_p13 }
  0x6d   : > { %p1897_p1 = pneg %p1896_p12 }
  0x6f   : > { %p1902_p4 = pnand %p1900_p2, %p1897_p1 }
  0x71   : > { %1905 = shalt.err (!%p1902_p4)
}
  0x72   : > { %s1906_s12 = scalar_lea.vmem %s351_s20, 256  ;;  %p1914_p3 = scmp.lt.s32.totalorder %s351_s20, %s351_s20 }
  0x73   : > { %p1907_p6 = scmp.ne.s32.totalorder %s351_s20, %s1906_s12  ;;  %p1915_p5 = scmp.lt.s32.totalorder %s1906_s12, %s1906_s12 }
  0x75   : > { %p1909_p8 = pnand %p1907_p6, %p2195_p13  ;;  %p1916_p7 = por %p1915_p5, %p1914_p3 }
  0x77   : > { %p1910_p0 = pneg %p1909_p8 }
  0x79   : > { %p1917_p10 = pnand %p1916_p7, %p1910_p0 }
  0x7b   : > { %1920 = shalt.err (!%p1917_p10)
}
  0x7c   : > { %1662 = dma.hbm_to_vmem [thread:$0]  (!%p2179_p11), %s2661_s7, 256, %s351_s20, [#allocation9], %s2046_s8, %s2046_s8, %s2047_s9  }
  0x7d   : > { %s40_s10 = sadd.s32 1, %s2037_s17  ;;  %s49_s28 = sadd.s32 1, %s2029_s15 }
  0x7e   : > { %p42_p13 = scmp.ge.s32.totalorder %s40_s10, 2  ;;  %p56_p9 = scmp.ne.s32.totalorder %s2029_s15, %s2025_s14 }
  0x7f   : > { %p57_p12 = scmp.eq.s32.totalorder %s2041_s18, 0  ;;  %p1675_p1 = scmp.lt.s32.totalorder %s2041_s18, 2 }
  0x80   : > { %s2709_s10 = smov (%p42_p13, %s40_s10), 0  ;;  %p2690_p4 = scmp.ne.s32.totalorder %s2681_s22, 0 }
  0x81   : > { %p58_p2 = por %p57_p12, %p56_p9  ;;  %s44_s24 = ssub.s32 %s2037_s17, %s2709_s10 }
  0x82   : > { %p2290_p6 = por %p2690_p4, %p56_p9  ;;  %s370_s26 = sand.u32 1, %s2029_s15  }
  0x83   : > { %p47_p8 = scmp.eq.s32.totalorder %s44_s24, 0  ;;  %s1512_s8 = sshll.u32 %s370_s26, 6 }
  0x84   : > { %s1550_s9 = sshll.u32 %s2037_s17, 10  ;;  %s374_s22 = scalar_lea.vmem [#allocation2], %s1512_s8 }
  0x85   : > { %s2299_s20 = scalar_select %p47_p8, %s2029_s15, %s49_s28  }
  0x86   : > { %s2304_s19 = scalar_lea.hbm %s2654_s0, %s1550_s9  ;;  %s383_s27 = sshll.u32 %s374_s22, 4  ;;  %s2312_s27 = int_to_ptr.vmem [resolvable:$true] %s383_s27 }
  0x87   : > { %p2308_p11 = pnand %p1675_p1, %p58_p2  ;;  %s2314_s12 = scalar_lea.sflag [#allocation3], %s370_s26 }
  0x88   : > { %s1921_s6 = scalar_lea.hbm %s2304_s19, 1024  ;;  %s1926_s24 = scalar_lea.hbm %s2654_s0, 2048 }
  0x89   : > { %p1922_p0 = scmp.ne.s32.totalorder %s2304_s19, %s1921_s6  ;;  %p1923_p3 = pneg %p2308_p11 }
  0x8a   : > { %p1927_p10 = scmp.lt.u32.totalorder %s2304_s19, %s2654_s0  ;;  %p1928_p13 = scmp.lt.u32.totalorder %s1926_s24, %s1921_s6 }
  0x8b   : > { %p1924_p5 = pnand %p1923_p3, %p1922_p0  ;;  %p1930_p12 = scmp.lt.u32.totalorder %s1921_s6, %s2304_s19 }
  0x8c   : > { %p1929_p9 = por %p1928_p13, %p1927_p10 }
  0x8d   : > { %p1925_p7 = pneg %p1924_p5 }
  0x8e   : > { %p1931_p1 = por %p1930_p12, %p1929_p9 }
  0x90   : > { %p1932_p2 = pnand %p1931_p1, %p1925_p7 }
  0x92   : > { %1935 = shalt.err (!%p1932_p2)
}
  0x93   : > { %s1936_s26 = scalar_lea.vmem %s2312_s27, 1024  ;;  %s2049_s29 = smov [#allocation2]  }
  0x94   : > { %p1937_p4 = scmp.ne.s32.totalorder %s2312_s27, %s1936_s26  ;;  %s1941_s11 = sshll.u32 %s2049_s29, 4  ;;  %s1942_s11 = int_to_ptr.vmem [resolvable:$false] %s1941_s11 }
  0x95   : > { %s1943_s22 = scalar_lea.vmem %s1942_s11, 2048  ;;  %p1944_p5 = scmp.lt.s32.totalorder %s2312_s27, %s1942_s11 }
  0x96   : > { %p1939_p8 = pnand %p1937_p4, %p1923_p3  ;;  %p1945_p10 = scmp.lt.s32.totalorder %s1943_s22, %s1936_s26 }
  0x98   : > { %p1940_p0 = pneg %p1939_p8  ;;  %p1946_p13 = por %p1945_p10, %p1944_p5 }
  0x9a   : > { %p1947_p9 = pnand %p1946_p13, %p1940_p0 }
  0x9c   : > { %1950 = shalt.err (!%p1947_p9)
}
  0x9d   : > { %s2050_s6 = smov 256   ;;  %s2051_s4 = smov 16  }
  0x9e   : > { %1666 = dma.hbm_to_vmem [thread:$0]  (!%p2308_p11), %s2304_s19, 1024, %s2312_s27, %s2314_s12, %s2050_s6, %s2050_s6, %s2051_s4  }
  0x9f   : > { %p2693_p3 = scmp.ne.s32.totalorder %s2685_s25, 0 }
  0xa0   : > { %s2345_s28 = sand.u32 (!%p2693_p3), 1, %s2025_s14   ;;  %p2694_p7 = scmp.ne.s32.totalorder (!%p2693_p3), %s2682_s23, 0 }
  0xa1   : > { %402 = sbr.rel (%p2693_p3) target bundleno = 1314 (0x522), region = 60  ;;  %s1516_s24 = sshll.u32 (!%p2693_p3), %s2345_s28, 6 }
  0xa2   : > { %s405_s8 = scalar_lea.sflag (!%p2693_p3), [#allocation3], %s2345_s28  ;;  %s2351_s9 = scalar_lea.vmem (!%p2693_p3), [#allocation2], %s1516_s24 }
  0xa8   : > { %2004 = dma.done.wait (%p2694_p7), %s405_s8, 1024  }
  0xa9   : > { %2006 = vsyncadd (%p2694_p7), %s405_s8, 4294966272  ;;  %p2695_p11 = scmp.ne.s32.totalorder %s2680_s21, 0 }
  0xab   : > { %2008 = dma.done.wait (%p2695_p11), [#allocation6], 288  }
  0xac   : > { %2010 = vsyncadd (%p2695_p11), [#allocation6], 4294967008 }
  0xad   : > { %2012 = dma.done.wait (%p2695_p11), [#allocation9], 512  }
  0xae   : > { %2014 = vsyncadd (%p2695_p11), [#allocation9], 4294966784  ;;  %p466_p12 = scmp.lt.s32.totalorder %s2033_s16, 1  ;;  %vm564_vm0 = vcmask 261120   ;;  %v1763_v4 = vld [vmem:[#allocation8] sm:$0xff]   ;;  %v2052_v5 = vmov 0.0   ;;  %v580_v19 = vlaneseq }
  0xaf   : > { %1574 = vmatprep.subr.bf16.mxu1 %v2052_v5  ;;  %vm2053_vm1 = vmmov 0   ;;  %v1764_v6 = vld [vmem:[#allocation8 + $0x8] sm:$0xff]   ;;  %v2381_v8 = vld [vmem:[%s2656_s2 + $0x8] sm:$0xff]  ;;  %v2386_v9 = vld [vmem:[%s2656_s2 + $0x10] sm:$0xff]  ;;  %s2054_s8 = smov 126   ;;  %v2055_v45 = vmov 0  }
  0xb0   : > { %s467_s25 = scalar_select %p466_p12, %s2033_s16, 1  ;;  %1578 = vmatprep.mubr.msk.bf16.mxu1 %vm2053_vm1, %v2052_v5  ;;  %1575 = vmatpush3.bf16.msra.mxu1 %v1763_v4  ;;  %v2376_v7 = vld [vmem:[%s2656_s2] sm:$0xff]  ;;  %v2393_v11 = vld [vmem:[%s2656_s2 + $0x18] sm:$0xff]  ;;  %v2397_v21 = vshrl.u32 %v580_v19, 7  ;;  %v1766_v37 = vld [vmem:[#allocation10 + $0x8] sm:$0xff]   ;;  %v2056_v46 = vmov 1  }
  0xb1   : > { %1576 = vmatprep.subr.bf16.mxu1 %v2052_v5  ;;  %v1745_v10 = vpack.i.bf16 %v2381_v8, %v2376_v7  ;;  %v1750_v12 = vpack.i.bf16 %v2393_v11, %v2386_v9  ;;  %v476_v23 = vld [vmem:[%s2657_s3] sm:$0x3]  ;;  %v1765_v32 = vld [vmem:[#allocation10] sm:$0xff]   ;;  %v1768_v44 = vld [vmem:[#allocation7 + $0x8] sm:$0xff]   ;;  %1756 = vset.pattern.permute.xlu1 %v2055_v45  ;;  %s2696_s23 = sld [smem:[#allocation21_spill]]  ;;  %s2697_s4 = sld [smem:[#allocation20_spill]] }
  0xb2   : > { %s1522_s19 = sshll.u32 %s467_s25, 3  ;;  %v582_v22 = vsub.s32 0, %v2397_v21  ;;  %v587_v24 = vsub.s32 1, %v2397_v21  ;;  %v1767_v43 = vld [vmem:[#allocation7] sm:$0xff]   ;;  %1755 = vset.pattern.permute.xlu0 %v2055_v45  ;;  %v2427_v48 = vld [vmem:[%s2351_s9 + $0x10] sm:$0xff]  ;;  %v2433_v50 = vld [vmem:[%s2351_s9 + $0x18] sm:$0xff] }
  0xb3   : > { %s469_s13 = scalar_lea.vmem %s2655_s1, %s1522_s19  ;;  %1746 = vrot.lane.b32.xlu1 %v1745_v10, %s2054_s8  ;;  %1590 = vmatprep.subr.bf16.mxu0 %v1767_v43  ;;  %v2424_v47 = vld [vmem:[%s2351_s9] sm:$0xff]  ;;  %v2430_v49 = vld [vmem:[%s2351_s9 + $0x8] sm:$0xff]  ;;  %v529_v53 = vmul.f32 %v2427_v48, %v2427_v48  ;;  %v530_v57 = vmul.f32 %v2433_v50, %v2433_v50  ;;  %v2457_v62 = vld [vmem:[%s2351_s9 + $0x30] sm:$0xff]  ;;  %s464_s19 = scalar_lea.vmem [#allocation11], %s1516_s24 }
  0xb4   : > { %v563_v0 = vld [vmem:[%s469_s13] sm:$0xff]  ;;  %1577 = vmatpush3.bf16.msra.mxu1 %v1764_v6  ;;  %v583_v26 = vrot.slane %v476_v23, %v582_v22  ;;  %v588_v29 = vrot.slane %v476_v23, %v587_v24  ;;  %1591 = vmatpush3.bf16.msra.mxu0 %v1767_v43  ;;  %v506_v51 = vadd.f32 %v2427_v48, %v2424_v47  ;;  %v2451_v58 = vld [vmem:[%s2351_s9 + $0x28] sm:$0xff]  ;;  %s1551_s27 = sshll.u32 %s2033_s16, 10  ;;  %s2698_s21 = sld [smem:[#allocation22_spill]] }
  0xb5   : > { %v565_v1 = vsel %vm564_vm0, %v563_v0, 0.0  ;;  %v569_v2 = vmul.f32 %v563_v0, %v563_v0  ;;  %1582 = vmatprep.subr.bf16.mxu1 %v2052_v5  ;;  %1592 = vmatprep.subr.bf16.mxu0 %v1768_v44  ;;  %v527_v52 = vmul.f32 %v2424_v47, %v2424_v47  ;;  %v2442_v54 = vld [vmem:[%s2351_s9 + $0x20] sm:$0xff]  ;;  %v515_v55 = vadd.f32 %v2433_v50, %v2430_v49  ;;  %s1352_s12 = scalar_lea.sflag [#allocation4], %s2345_s28  ;;  %s2058_s29 = smov [#allocation11]  }
  0xb6   : > { %566 = vadd.xlane.f32.xlu0 %v565_v1  ;;  %v528_v56 = vmul.f32 %v2430_v49, %v2430_v49  ;;  %v507_v59 = vadd.f32 %v506_v51, %v2442_v54  ;;  %v531_v60 = vmul.f32 %v2442_v54, %v2442_v54  ;;  %v533_v4 = vmul.f32 %v2457_v62, %v2457_v62  ;;  %s1955_s11 = sshll.u32 %s2058_s29, 4  ;;  %s1956_s11 = int_to_ptr.vmem [resolvable:$false] %s1955_s11 }
  0xb7   : > { %v570_v3 = vsel %vm564_vm0, %v569_v2, 0.0  ;;  %1751 = vrot.lane.b32.xlu1 %v1750_v12, %s2054_s8  ;;  %v535_v61 = vadd.f32 %v529_v53, %v527_v52  ;;  %v516_v63 = vadd.f32 %v515_v55, %v2451_v58  ;;  %v2463_v2 = vld [vmem:[%s2351_s9 + $0x38] sm:$0xff]  ;;  %v495_v53 = vld [vmem:[%s2696_s23 + $0x8] sm:$0xff]  ;;  %s1367_s9 = sshll.u32 %s464_s19, 4  ;;  %s1957_s22 = scalar_lea.vmem %s1956_s11, 2048  ;;  %s2597_s9 = int_to_ptr.vmem [resolvable:$true] %s1367_s9 }
  0xb8   : > { %1593 = vmatpush3.bf16.msra.mxu0 %v1768_v44  ;;  %v544_v1 = vadd.f32 %v530_v57, %v528_v56  ;;  %v534_v10 = vmul.f32 %v2463_v2, %v2463_v2  ;;  %v497_v55 = vld [vmem:[%s2696_s23 + $0x18] sm:$0xff]  ;;  %v494_v57 = vld [vmem:[%s2696_s23] sm:$0xff]  ;;  %s1951_s26 = scalar_lea.vmem %s2597_s9, 1024  ;;  %p1958_p8 = scmp.lt.s32.totalorder %s2597_s9, %s1956_s11 }
  0xb9   : > { %v517_v6 = vadd.f32 %v516_v63, %v2463_v2  ;;  %p1952_p1 = scmp.ne.s32.totalorder %s2597_s9, %s1951_s26  ;;  %p1959_p0 = scmp.lt.s32.totalorder %s1957_s22, %s1951_s26 }
  0xba   : > { %571 = vadd.xlane.f32.xlu0 %v570_v3  ;;  %v508_v3 = vadd.f32 %v507_v59, %v2457_v62  ;;  %s2604_s16 = scalar_lea.hbm %s2698_s21, %s1551_s27 }
  0xbb   : > { %994 = vperm.xlu1 %1756, %v2381_v8   ;;  %p1953_p2 = pnand %p1952_p1, %p2290_p6  ;;  %p1960_p5 = por %p1959_p0, %p1958_p8 }
  0xbd   : > { %p1954_p4 = pneg %p1953_p2 }
  0xbf   : > { %1757 = vset.pattern.permute.xlu1 %v2056_v46  ;;  %p1961_p10 = pnand %p1960_p5, %p1954_p4 }
  0xc0   : > { %1014 = vperm.xlu1 %1757, %v2376_v7  }
  0xc4   : > { %1018 = vperm.xlu1 %1757, %v2381_v8  }
  0xc8   : > { %1758 = vset.pattern.permute.xlu1 %v2055_v45 }
  0xc9   : > { %998 = vperm.xlu1 %1758, %v2386_v9  }
  0xcd   : > { %1002 = vperm.xlu1 %1758, %v2393_v11  }
  0xd0   : > { %990 = vperm.xlu0 %1755, %v2376_v7  }
  0xd1   : > { %1759 = vset.pattern.permute.xlu1 %v2056_v46 }
  0xd2   : > { %1022 = vperm.xlu1 %1759, %v2386_v9  }
  0xd6   : > { %1026 = vperm.xlu1 %1759, %v2393_v11  }
  0xda   : > { %1760 = vset.pattern.permute.xlu1 %v2055_v45 }
 0x125   : > { %v1747_v33 = vpop.permute.xlu1 %1746 }
 0x126   : > { %v1749_v35 = vunpack.i.h.bf16 %v1747_v33  ;;  %v1748_v36 = vunpack.i.l.bf16 %v1747_v33 }
 0x128   : > { %v1620_v39 = vpack.c.bf16 %v1749_v35, %v1748_v36 }
 0x129   : > { %v1752_v38 = vpop.permute.xlu1 %1751 }
 0x12a   : > { %v1754_v40 = vunpack.i.h.bf16 %v1752_v38  ;;  %v1753_v41 = vunpack.i.l.bf16 %v1752_v38 }
 0x12c   : > { %v1624_v42 = vpack.c.bf16 %v1754_v40, %v1753_v41  ;;  %v477_v40 = vld [vmem:[#allocation5] sm:$0x3] }
 0x12d   : > { %v594_v46 = vrot.slane %v477_v40, %v582_v22  ;;  %v496_v22 = vld [vmem:[%s2696_s23 + $0x10] sm:$0xff] }
 0x143   : > { %v567_v13 = vpop.xlane.xlu0 %566 }
 0x144   : > { %v568_v14 = vmul.f32 0.03125, %v567_v13  ;;  %v509_v13 = vrot.slane %v508_v3, 4 }
 0x146   : > { %v575_v16 = vmul.f32 %v568_v14, %v568_v14  ;;  %v574_v25 = vsub.f32 %v563_v0, %v568_v14  ;;  %v532_v0 = vmul.f32 %v2451_v58, %v2451_v58 }
 0x147   : > { %v572_v15 = vpop.xlane.xlu0 %571 }
 0x148   : > { %v573_v17 = vmul.f32 0.03125, %v572_v15  ;;  %v545_v12 = vadd.f32 %v544_v1, %v532_v0  ;;  %v518_v15 = vrot.slane %v517_v6, 4 }
 0x14a   : > { %v576_v18 = vsub.f32 %v573_v17, %v575_v16  ;;  %v546_v16 = vadd.f32 %v545_v12, %v534_v10  ;;  %v510_v17 = vadd.f32 %v509_v13, %v508_v3  ;;  %v519_v19 = vadd.f32 %v518_v15, %v517_v6 }
 0x14c   : > { %v577_v20 = vadd.f32 1e-05, %v576_v18  ;;  %v511_v23 = vrot.slane %v510_v17, 2 }
 0x14e   : > { %1771 = vrsqrt.f32 %v577_v20  ;;  %v547_v20 = vrot.slane %v546_v16, 4 }
 0x158   : > { %v1772_v27 = vpop.eup %1771 }
 0x159   : > { %v579_v28 = vmul.f32 %v1772_v27, %v574_v25  ;;  %v548_v27 = vadd.f32 %v547_v20, %v546_v16 }
 0x15b   : > { %v584_v30 = vmul.f32 %v583_v26, %v579_v28  ;;  %v520_v26 = vrot.slane %v519_v19, 2  ;;  %v512_v28 = vadd.f32 %v511_v23, %v510_v17 }
 0x15d   : > { %v589_v31 = vadd.f32 %v588_v29, %v584_v30  ;;  %v521_v30 = vadd.f32 %v520_v26, %v519_v19 }
 0x15f   : > { %v590_v34 = vpack.c.bf16 %v589_v31, %v589_v31  ;;  %v549_v31 = vrot.slane %v548_v27, 2 }
 0x161   : > { %1579 = vmatmul.mubr.msk.bf16.vlgmr.msra.gmra.mrb[0].mxu1 %vm564_vm0, %v590_v34  ;;  %v550_v35 = vadd.f32 %v549_v31, %v548_v27 }
 0x162   : > { %1583 = vmatpush3.bf16.msra.mxu1 %v1765_v32  ;;  %1586 = vmatprep.mubr.msk.bf16.mxu1 %vm2053_vm1, %v2052_v5  ;;  %v513_v32 = vrot.slane %v512_v28, 1 }
 0x163   : > { %1584 = vmatprep.subr.bf16.mxu1 %v2052_v5  ;;  %v536_v5 = vadd.f32 %v535_v61, %v531_v60 }
 0x164   : > { %v514_v36 = vadd.f32 %v513_v32, %v512_v28 }
 0x165   : > { %v537_v14 = vadd.f32 %v536_v5, %v533_v4 }
 0x166   : > { %1585 = vmatpush3.bf16.msra.mxu1 %v1766_v37  ;;  %v2471_v41 = vmul.f32 0.03125, %v514_v36 }
 0x167   : > { %1621 = vmatprep.subr.bf16.mxu1 %v1620_v39  ;;  %v538_v18 = vrot.slane %v537_v14, 4 }
 0x168   : > { %v555_v52 = vmul.f32 %v2471_v41, %v2471_v41  ;;  %v973_v32 = vsub.f32 %v2424_v47, %v2471_v41  ;;  %v975_v36 = vsub.f32 %v2427_v48, %v2471_v41 }
 0x169   : > { %1587 = vmatmul.mubr.msk.bf16.vlgmr.msra.gmra.mrb[4].mxu1 %vm564_vm0, %v590_v34  ;;  %v539_v25 = vadd.f32 %v538_v18, %v537_v14  ;;  %v522_v34 = vrot.slane %v521_v30, 1  ;;  %v653_v14 = vrot.slane %v477_v40, %v587_v24 }
 0x16a   : > { %1623 = vmatpush3.bf16.msra.mxu1 %v1620_v39  ;;  %v551_v39 = vrot.slane %v550_v35, 1 }
 0x16b   : > { %1625 = vmatprep.subr.bf16.mxu1 %v1624_v42  ;;  %v540_v29 = vrot.slane %v539_v25, 2  ;;  %v523_v38 = vadd.f32 %v522_v34, %v521_v30 }
 0x16c   : > { %v552_v44 = vadd.f32 %v551_v39, %v550_v35 }
 0x16d   : > { %v541_v33 = vadd.f32 %v540_v29, %v539_v25  ;;  %v2473_v43 = vmul.f32 0.03125, %v523_v38  ;;  %v995_v38 = vpop.permute.xlu1 %994 }
 0x16e   : > { %1627 = vmatpush3.bf16.msra.mxu1 %v1624_v42  ;;  %v554_v59 = vmul.f32 0.03125, %v552_v44 }
 0x16f   : > { %v542_v37 = vrot.slane %v541_v33, 1  ;;  %v556_v60 = vmul.f32 %v2473_v43, %v2473_v43 }
 0x171   : > { %v543_v42 = vadd.f32 %v542_v37, %v541_v33  ;;  %v558_v12 = vsub.f32 %v554_v59, %v556_v60  ;;  %v974_v33 = vsub.f32 %v2430_v49, %v2473_v43  ;;  %v976_v37 = vsub.f32 %v2433_v50, %v2473_v43 }
 0x173   : > { %v553_v51 = vmul.f32 0.03125, %v543_v42  ;;  %v560_v18 = vadd.f32 1e-05, %v558_v12  ;;  %v991_v42 = vpop.permute.xlu0 %990 }
 0x175   : > { %v557_v1 = vsub.f32 %v553_v51, %v555_v52 }
 0x177   : > { %v559_v16 = vadd.f32 1e-05, %v557_v1  ;;  %v977_v1 = vsub.f32 %v2442_v54, %v2471_v41 }
 0x179   : > { %1773 = vrsqrt.f32 %v559_v16 }
 0x17a   : > { %1775 = vrsqrt.f32 %v560_v18 }
 0x183   : > { %v1774_v31 = vpop.eup %1773 }
 0x184   : > { %v1776_v34 = vpop.eup %1775  ;;  %v981_v39 = vmul.f32 %v1774_v31, %v973_v32  ;;  %v983_v44 = vmul.f32 %v1774_v31, %v975_v36 }
 0x185   : > { %v982_v40 = vmul.f32 %v1776_v34, %v974_v33 }
 0x186   : > { %v1005_v51 = vmul.f32 %v991_v42, %v981_v39 }
 0x187   : > { %v1006_v52 = vmul.f32 %v991_v42, %v982_v40 }
 0x234   : > { %v644_v56 = vpop.f32.mrb[0].mxu1 }
 0x235   : > { %v645_v61 = vadd.f32 %v644_v56, %v594_v46  ;;  %v1580_v63 = vpop.f32.mrb[1].mxu1  ;;  %v984_v46 = vmul.f32 %v1776_v34, %v976_v37 }
 0x236   : > { %v647_v0 = vpop.f32.mrb[2].mxu1 }
 0x237   : > { %v707_v3 = vmul.f32 %v645_v61, %v495_v53  ;;  %v709_v4 = vmul.f32 %v645_v61, %v497_v55  ;;  %v1581_v5 = vpop.f32.mrb[3].mxu1  ;;  %v706_v6 = vmul.f32 %v645_v61, %v494_v57  ;;  %v708_v10 = vmul.f32 %v645_v61, %v496_v22 }
 0x238   : > { %v1008_v56 = vmul.f32 %v995_v38, %v984_v46  ;;  %v979_v5 = vsub.f32 %v2457_v62, %v2471_v41 }
 0x239   : > { %1606 = vmatprep.mubr.msk.f32.mxu1 %vm564_vm0, %v706_v6  ;;  %v714_v13 = vpack.c.bf16 %v707_v3, %v706_v6  ;;  %v715_v15 = vpack.c.bf16 %v709_v4, %v708_v10  ;;  %v980_v6 = vsub.f32 %v2463_v2, %v2473_v43 }
 0x23a   : > { %1607 = vmatmul.mubr.msk.f32.vlgmr.msra.gmra.mrb[8].mxu1 %vm564_vm0, %v707_v3  ;;  %v978_v3 = vsub.f32 %v2451_v58, %v2473_v43  ;;  %v1769_v43 = vld [vmem:[%s2697_s4] sm:$0xff]  }
 0x23b   : > { %1594 = vmatprep.mubr.msk.bf16.mxu0 %vm564_vm0, %v714_v13  ;;  %1609 = vmatprep.mubr.msk.f32.mxu1 %vm564_vm0, %v708_v10  ;;  %v985_v10 = vmul.f32 %v1774_v31, %v977_v1 }
 0x23c   : > { %v700_v17 = vpop.f32.mrb[4].mxu1  ;;  %1595 = vmatmul.mubr.msk.bf16.vlgmr.msra.gmra.mrb[0].mxu0 %vm564_vm0, %v715_v15  ;;  %v986_v12 = vmul.f32 %v1776_v34, %v978_v3  ;;  %v988_v15 = vmul.f32 %v1776_v34, %v980_v6 }
 0x23d   : > { %v701_v19 = vadd.f32 %v700_v17, %v653_v14  ;;  %v1588_v20 = vpop.f32.mrb[5].mxu1  ;;  %v987_v14 = vmul.f32 %v1774_v31, %v979_v5  ;;  %1616 = vmatprep.mubr.msk.bf16.mxu0 %vm564_vm0, %v1769_v43 }
 0x23e   : > { %v703_v23 = vpop.f32.mrb[6].mxu1  ;;  %1610 = vmatmul.mubr.msk.f32.gmra.mrb[10].mxu1 %vm564_vm0, %v709_v4 }
 0x23f   : > { %v710_v21 = vmul.f32 %v701_v19, %v494_v57  ;;  %v711_v24 = vmul.f32 %v701_v19, %v495_v53  ;;  %v712_v25 = vmul.f32 %v701_v19, %v496_v22  ;;  %v713_v26 = vmul.f32 %v701_v19, %v497_v55  ;;  %v1589_v27 = vpop.f32.mrb[7].mxu1  ;;  %1099 = vmatprep.mubr.bf16.mxu1 %v2055_v45  ;;  %v1015_v53 = vpop.permute.xlu1 %1014 }
 0x240   : > { %v1007_v55 = vmul.f32 %v995_v38, %v983_v44  ;;  %v1029_v57 = vadd.f32 %v1015_v53, %v1005_v51  ;;  %v1030_v22 = vadd.f32 %v1015_v53, %v1006_v52  ;;  %v2057_v52 = vmov 3  }
 0x241   : > { %v898_v28 = vpack.c.bf16 %v711_v24, %v710_v21  ;;  %v899_v30 = vpack.c.bf16 %v713_v26, %v712_v25  ;;  %1761 = vset.pattern.permute.xlu0 %v2057_v52 }
 0x242   : > { %1261 = vperm.xlu0 %1761, %v2376_v7  }
 0x243   : > { %1628 = vmatprep.subr.msk.bf16.mxu0 %vm564_vm0, %v898_v28  ;;  %v917_v29 = vsel %vm564_vm0, %v898_v28, 0  ;;  %v920_v35 = vsel %vm564_vm0, %v899_v30, 0  ;;  %v1019_v59 = vpop.permute.xlu1 %1018  ;;  %v1770_v28 = vld [vmem:[%s2697_s4 + $0x8] sm:$0xff]  }
 0x244   : > { %1613 = vmatpush3.bf16.xpose.msra.mxu0 %v917_v29  ;;  %v1031_v60 = vadd.f32 %v1019_v59, %v1007_v55  ;;  %v1032_v61 = vadd.f32 %v1019_v59, %v1008_v56 }
 0x245   : > { %1629 = vmatprep.subr.msk.bf16.mxu0 %vm564_vm0, %v899_v30 }
 0x246   : > { %v1037_v63 = vpack.c.bf16 %v1031_v60, %v1029_v57  ;;  %v1038_v0 = vpack.c.bf16 %v1032_v61, %v1030_v22  ;;  %1273 = vperm.xlu0 %1761, %v2393_v11  }
 0x247   : > { %v999_v4 = vpop.permute.xlu1 %998 }
 0x248   : > { %1067 = vmatprep.subr.bf16.mxu1 %v1038_v0  ;;  %v1009_v16 = vmul.f32 %v999_v4, %v985_v10  ;;  %v1010_v17 = vmul.f32 %v999_v4, %v986_v12 }
 0x249   : > { %1068 = vmatpush1.bf16.msra.mxu1 %v1037_v63 }
 0x24b   : > { %v1003_v13 = vpop.permute.xlu1 %1002 }
 0x24c   : > { %1615 = vmatpush3.bf16.xpose.msra.mxu0 %v920_v35  ;;  %v1011_v19 = vmul.f32 %v1003_v13, %v987_v14  ;;  %v1012_v20 = vmul.f32 %v1003_v13, %v988_v15 }
 0x24f   : > { %v1023_v18 = vpop.permute.xlu1 %1022 }
 0x250   : > { %v1033_v23 = vadd.f32 %v1023_v18, %v1009_v16  ;;  %v1034_v21 = vadd.f32 %v1023_v18, %v1010_v17 }
 0x253   : > { %v1027_v24 = vpop.permute.xlu1 %1026  ;;  %1617 = vmatmul.mubr.msk.bf16.vlgmr.msra.gmra.mrb[4].mxu0 %vm564_vm0, %v1770_v28 }
 0x254   : > { %v1035_v25 = vadd.f32 %v1027_v24, %v1011_v19  ;;  %v1036_v26 = vadd.f32 %v1027_v24, %v1012_v20  ;;  %1314 = vmatprep.mubr.bf16.mxu0 %v2055_v45 }
 0x256   : > { %v1039_v27 = vpack.c.bf16 %v1035_v25, %v1033_v23  ;;  %v1040_v41 = vpack.c.bf16 %v1036_v26, %v1034_v21 }
 0x258   : > { %1069 = vmatprep.subr.bf16.mxu1 %v1040_v41 }
 0x259   : > { %1070 = vmatpush1.bf16.msra.mxu1 %v1039_v27 }
 0x30d   : > { %v1608_v29 = vpop.f32.mrb[8].mxu1 }
 0x30e   : > { %1048 = vperm.xlu1 %1760, %v1608_v29   ;;  %v879_v30 = vpop.f32.mrb[9].mxu1 }
 0x30f   : > { %v1596_v31 = vpop.f32.mrb[0].mxu0 }
 0x310   : > { %v768_v32 = vpop.f32.mrb[1].mxu0 }
 0x311   : > { %v1597_v33 = vpop.f32.mrb[2].mxu0  ;;  %v1611_v34 = vpop.f32.mrb[10].mxu1 }
 0x312   : > { %v784_v35 = vpack.c.bf16 %v1597_v33, %v1596_v31  ;;  %v771_v36 = vpop.f32.mrb[3].mxu0  ;;  %1043 = vperm.xlu1 %1760, %v879_v30   ;;  %v889_v37 = vpop.f32.mrb[11].mxu1 }
 0x313   : > { %v783_v38 = vpack.c.bf16 %v771_v36, %v768_v32 }
 0x315   : > { %1541 = vmatmul.mubr.msk.bf16.vlgmr.msra.gmra.mrb[12].mxu1 %vm564_vm0, %v783_v38 }
 0x316   : > { %1053 = vperm.xlu1 %1760, %v889_v37   ;;  %1109 = vmatprep.mubr.bf16.mxu1 %v2055_v45 }
 0x31a   : > { %1058 = vperm.xlu1 %1760, %v1611_v34  }
 0x31d   : > { %1542 = vmatmul.mubr.msk.bf16.gmra.mrb[16].mxu1 %vm564_vm0, %v784_v35 }
 0x31e   : > { %1762 = vset.pattern.permute.xlu1 %v2057_v52 }
 0x31f   : > { %1265 = vperm.xlu1 %1762, %v2381_v8  }
 0x323   : > { %1269 = vperm.xlu1 %1762, %v2386_v9  }
 0x326   : > { %v2534_v39 = vpop.f32.mrb[4].mxu0 }
 0x327   : > { %v2536_v40 = vpop.f32.mrb[5].mxu0 }
 0x328   : > { %v2538_v42 = vpop.f32.mrb[6].mxu0 }
 0x329   : > { %v972_v44 = vpack.c.bf16 %v2538_v42, %v2534_v39  ;;  %v2542_v46 = vpop.f32.mrb[7].mxu0 }
 0x32a   : > { %v971_v51 = vpack.c.bf16 %v2542_v46, %v2536_v40 }
 0x38d   : > { %v1049_v53 = vpop.permute.xlu1 %1048 }
 0x391   : > { %v1044_v55 = vpop.permute.xlu1 %1043 }
 0x395   : > { %v1054_v1 = vpop.permute.xlu1 %1053 }
 0x399   : > { %v1059_v18 = vpop.permute.xlu1 %1058 }
 0x3e8   : > { %v1101_v56 = vpop.f32.mrb[12].mxu1 }
 0x3e9   : > { %v1102_v57 = vadd.f32 %v1101_v56, %v1044_v55  ;;  %v1103_v22 = vpop.f32.mrb[13].mxu1 }
 0x3ea   : > { %v1104_v59 = vadd.f32 %v1103_v22, %v1044_v55  ;;  %v1105_v60 = vpop.f32.mrb[14].mxu1 }
 0x3eb   : > { %v1120_v61 = vrot.slane %v1102_v57, 4  ;;  %v1106_v63 = vadd.f32 %v1105_v60, %v1049_v53  ;;  %v1107_v0 = vpop.f32.mrb[15].mxu1 }
 0x3ec   : > { %v1126_v3 = vrot.slane %v1104_v59, 4  ;;  %v1108_v4 = vadd.f32 %v1107_v0, %v1049_v53 }
 0x3ed   : > { %v1121_v7 = vmax.f32 %v1102_v57, %v1120_v61  ;;  %v1132_v5 = vrot.slane %v1106_v63, 4 }
 0x3ee   : > { %v1127_v8 = vmax.f32 %v1104_v59, %v1126_v3  ;;  %v1138_v6 = vrot.slane %v1108_v4, 4 }
 0x3ef   : > { %v1122_v11 = vrot.slane %v1121_v7, 2  ;;  %v1133_v10 = vmax.f32 %v1106_v63, %v1132_v5 }
 0x3f0   : > { %v1128_v9 = vrot.slane %v1127_v8, 2  ;;  %v1139_v12 = vmax.f32 %v1108_v4, %v1138_v6  ;;  %v1111_v13 = vpop.f32.mrb[16].mxu1 }
 0x3f1   : > { %v1123_v14 = vmax.f32 %v1121_v7, %v1122_v11  ;;  %v1134_v15 = vrot.slane %v1133_v10, 2  ;;  %v1112_v16 = vadd.f32 %v1111_v13, %v1054_v1  ;;  %v1113_v17 = vpop.f32.mrb[17].mxu1 }
 0x3f2   : > { %v1129_v19 = vmax.f32 %v1127_v8, %v1128_v9  ;;  %v1140_v20 = vrot.slane %v1139_v12, 2  ;;  %v1114_v23 = vadd.f32 %v1113_v17, %v1054_v1  ;;  %v1115_v21 = vpop.f32.mrb[18].mxu1 }
 0x3f3   : > { %v1124_v24 = vrot.slane %v1123_v14, 1  ;;  %v1135_v25 = vmax.f32 %v1133_v10, %v1134_v15  ;;  %v1144_v26 = vrot.slane %v1112_v16, 4  ;;  %v1116_v27 = vadd.f32 %v1115_v21, %v1059_v18  ;;  %v1117_v41 = vpop.f32.mrb[19].mxu1 }
 0x3f4   : > { %v1130_v43 = vrot.slane %v1129_v19, 1  ;;  %v1141_v28 = vmax.f32 %v1139_v12, %v1140_v20  ;;  %v1150_v29 = vrot.slane %v1114_v23, 4  ;;  %v1118_v30 = vadd.f32 %v1117_v41, %v1059_v18 }
 0x3f5   : > { %v1125_v31 = vmax.f32 %v1123_v14, %v1124_v24  ;;  %v1136_v32 = vrot.slane %v1135_v25, 1  ;;  %v1145_v33 = vmax.f32 %v1112_v16, %v1144_v26  ;;  %v1156_v34 = vrot.slane %v1116_v27, 4 }
 0x3f6   : > { %v1131_v35 = vmax.f32 %v1129_v19, %v1130_v43  ;;  %v1142_v36 = vrot.slane %v1141_v28, 1  ;;  %v1151_v37 = vmax.f32 %v1114_v23, %v1150_v29  ;;  %v1162_v38 = vrot.slane %v1118_v30, 4 }
 0x3f7   : > { %v1168_v52 = vsub.f32 %v1102_v57, %v1125_v31  ;;  %v1137_v53 = vmax.f32 %v1135_v25, %v1136_v32  ;;  %v1146_v55 = vrot.slane %v1145_v33, 2  ;;  %v1157_v56 = vmax.f32 %v1116_v27, %v1156_v34 }
 0x3f8   : > { %v1169_v22 = vsub.f32 %v1104_v59, %v1131_v35  ;;  %v1143_v60 = vmax.f32 %v1141_v28, %v1142_v36  ;;  %v1152_v61 = vrot.slane %v1151_v37, 2  ;;  %v1163_v0 = vmax.f32 %v1118_v30, %v1162_v38 }
 0x3f9   : > { %v1176_v1 = vmul.f32 1.442695, %v1168_v52  ;;  %v1170_v3 = vsub.f32 %v1106_v63, %v1137_v53  ;;  %v1147_v7 = vmax.f32 %v1145_v33, %v1146_v55  ;;  %v1158_v5 = vrot.slane %v1157_v56, 2 }
 0x3fa   : > { %v1178_v8 = vmul.f32 1.442695, %v1169_v22  ;;  %v1171_v6 = vsub.f32 %v1108_v4, %v1143_v60  ;;  %v1153_v11 = vmax.f32 %v1151_v37, %v1152_v61  ;;  %v1164_v10 = vrot.slane %v1163_v0, 2 }
 0x3fb   : > { %1777 = vpow2.f32 %v1176_v1  ;;  %v1180_v9 = vmul.f32 1.442695, %v1170_v3  ;;  %v1148_v12 = vrot.slane %v1147_v7, 1  ;;  %v1159_v13 = vmax.f32 %v1157_v56, %v1158_v5 }
 0x3fc   : > { %1779 = vpow2.f32 %v1178_v8  ;;  %v1182_v57 = vmul.f32 1.442695, %v1171_v6  ;;  %v1154_v14 = vrot.slane %v1153_v11, 1  ;;  %v1165_v15 = vmax.f32 %v1163_v0, %v1164_v10 }
 0x3fd   : > { %1781 = vpow2.f32 %v1180_v9  ;;  %v1149_v59 = vmax.f32 %v1147_v7, %v1148_v12  ;;  %v1160_v17 = vrot.slane %v1159_v13, 1 }
 0x3fe   : > { %1783 = vpow2.f32 %v1182_v57  ;;  %v1155_v18 = vmax.f32 %v1153_v11, %v1154_v14  ;;  %v1166_v63 = vrot.slane %v1165_v15, 1 }
 0x3ff   : > { %v1172_v19 = vsub.f32 %v1112_v16, %v1149_v59  ;;  %v1161_v20 = vmax.f32 %v1159_v13, %v1160_v17 }
 0x400   : > { %v1173_v21 = vsub.f32 %v1114_v23, %v1155_v18  ;;  %v1167_v4 = vmax.f32 %v1165_v15, %v1166_v63 }
 0x401   : > { %v1184_v24 = vmul.f32 1.442695, %v1172_v19  ;;  %v1174_v25 = vsub.f32 %v1116_v27, %v1161_v20 }
 0x402   : > { %v1186_v26 = vmul.f32 1.442695, %v1173_v21  ;;  %v1175_v41 = vsub.f32 %v1118_v30, %v1167_v4 }
 0x403   : > { %1785 = vpow2.f32 %v1184_v24  ;;  %v1188_v43 = vmul.f32 1.442695, %v1174_v25 }
 0x404   : > { %1787 = vpow2.f32 %v1186_v26  ;;  %v1190_v28 = vmul.f32 1.442695, %v1175_v41 }
 0x405   : > { %v2550_v29 = vpop.eup %1777  ;;  %1789 = vpow2.f32 %v1188_v43 }
 0x406   : > { %v2552_v31 = vpop.eup %1779  ;;  %1791 = vpow2.f32 %v1190_v28  ;;  %v1192_v32 = vrot.slane %v2550_v29, 4 }
 0x407   : > { %v2555_v16 = vpop.eup %1781  ;;  %v1198_v23 = vrot.slane %v2552_v31, 4 }
 0x408   : > { %v2558_v33 = vpop.eup %1783  ;;  %v1193_v27 = vadd.f32 %v2550_v29, %v1192_v32  ;;  %v1204_v30 = vrot.slane %v2555_v16, 4 }
 0x409   : > { %v1199_v34 = vadd.f32 %v2552_v31, %v1198_v23  ;;  %v1210_v35 = vrot.slane %v2558_v33, 4 }
 0x40a   : > { %v1194_v36 = vrot.slane %v1193_v27, 2  ;;  %v1205_v37 = vadd.f32 %v2555_v16, %v1204_v30 }
 0x40b   : > { %v1200_v38 = vrot.slane %v1199_v34, 2  ;;  %v1211_v52 = vadd.f32 %v2558_v33, %v1210_v35 }
 0x40c   : > { %v1195_v53 = vadd.f32 %v1194_v36, %v1193_v27  ;;  %v1206_v55 = vrot.slane %v1205_v37, 2 }
 0x40d   : > { %v2566_v56 = vpop.eup %1785  ;;  %v1201_v22 = vadd.f32 %v1200_v38, %v1199_v34  ;;  %v1212_v60 = vrot.slane %v1211_v52, 2 }
 0x40e   : > { %v2568_v61 = vpop.eup %1787  ;;  %v1196_v0 = vrot.slane %v1195_v53, 1  ;;  %v1207_v1 = vadd.f32 %v1206_v55, %v1205_v37  ;;  %v1216_v3 = vrot.slane %v2566_v56, 4 }
 0x40f   : > { %v1790_v7 = vpop.eup %1789  ;;  %v1202_v5 = vrot.slane %v1201_v22, 1  ;;  %v1213_v8 = vadd.f32 %v1212_v60, %v1211_v52  ;;  %v1222_v6 = vrot.slane %v2568_v61, 4 }
 0x410   : > { %v1792_v11 = vpop.eup %1791  ;;  %v1197_v10 = vadd.f32 %v1196_v0, %v1195_v53  ;;  %v1208_v9 = vrot.slane %v1207_v1, 1  ;;  %v1217_v12 = vadd.f32 %v2566_v56, %v1216_v3  ;;  %v1228_v13 = vrot.slane %v1790_v7, 4 }
 0x411   : > { %v1203_v57 = vadd.f32 %v1202_v5, %v1201_v22  ;;  %v1214_v14 = vrot.slane %v1213_v8, 1  ;;  %v1223_v15 = vadd.f32 %v2568_v61, %v1222_v6  ;;  %v1234_v59 = vrot.slane %v1792_v11, 4 }
 0x412   : > { %v1209_v17 = vadd.f32 %v1208_v9, %v1207_v1  ;;  %1793 = vrcp.f32 %v1197_v10  ;;  %v1218_v18 = vrot.slane %v1217_v12, 2  ;;  %v1229_v63 = vadd.f32 %v1790_v7, %v1228_v13 }
 0x413   : > { %v1215_v19 = vadd.f32 %v1214_v14, %v1213_v8  ;;  %1795 = vrcp.f32 %v1203_v57  ;;  %v1224_v20 = vrot.slane %v1223_v15, 2  ;;  %v1235_v21 = vadd.f32 %v1792_v11, %v1234_v59 }
 0x414   : > { %1797 = vrcp.f32 %v1209_v17  ;;  %v1219_v4 = vadd.f32 %v1218_v18, %v1217_v12  ;;  %v1230_v24 = vrot.slane %v1229_v63, 2 }
 0x415   : > { %1799 = vrcp.f32 %v1215_v19  ;;  %v1225_v25 = vadd.f32 %v1224_v20, %v1223_v15  ;;  %v1236_v26 = vrot.slane %v1235_v21, 2 }
 0x416   : > { %v1220_v41 = vrot.slane %v1219_v4, 1  ;;  %v1231_v43 = vadd.f32 %v1230_v24, %v1229_v63 }
 0x417   : > { %v1226_v28 = vrot.slane %v1225_v25, 1  ;;  %v1237_v32 = vadd.f32 %v1236_v26, %v1235_v21 }
 0x418   : > { %v1221_v23 = vadd.f32 %v1220_v41, %v1219_v4  ;;  %v1232_v27 = vrot.slane %v1231_v43, 1 }
 0x419   : > { %v1227_v30 = vadd.f32 %v1226_v28, %v1225_v25  ;;  %v1238_v34 = vrot.slane %v1237_v32, 1 }
 0x41a   : > { %v1233_v35 = vadd.f32 %v1232_v27, %v1231_v43  ;;  %1801 = vrcp.f32 %v1221_v23 }
 0x41b   : > { %v1239_v36 = vadd.f32 %v1238_v34, %v1237_v32  ;;  %1803 = vrcp.f32 %v1227_v30 }
 0x41c   : > { %v1794_v37 = vpop.eup %1793  ;;  %1805 = vrcp.f32 %v1233_v35 }
 0x41d   : > { %v1796_v38 = vpop.eup %1795  ;;  %1807 = vrcp.f32 %v1239_v36  ;;  %v1248_v55 = vmul.f32 %v1794_v37, %v2550_v29 }
 0x41e   : > { %v1798_v52 = vpop.eup %1797  ;;  %v1249_v60 = vmul.f32 %v1796_v38, %v2552_v31  ;;  %v1262_v31 = vpop.permute.xlu0 %1261 }
 0x41f   : > { %v1800_v53 = vpop.eup %1799  ;;  %v1250_v22 = vmul.f32 %v1798_v52, %v2555_v16 }
 0x420   : > { %v1251_v0 = vmul.f32 %v1800_v53, %v2558_v33 }
 0x421   : > { %v1256_v1 = vpack.c.bf16 %v1250_v22, %v1248_v55 }
 0x422   : > { %v1257_v3 = vpack.c.bf16 %v1251_v0, %v1249_v60  ;;  %v1274_v18 = vpop.permute.xlu0 %1273 }
 0x424   : > { %v1802_v5 = vpop.eup %1801  ;;  %1282 = vmatprep.subr.bf16.mxu0 %v1257_v3 }
 0x425   : > { %v1804_v8 = vpop.eup %1803  ;;  %1283 = vmatpush1.bf16.msra.mxu0 %v1256_v1  ;;  %v1252_v9 = vmul.f32 %v1802_v5, %v2566_v56  ;;  %v1266_v56 = vpop.permute.xlu1 %1265 }
 0x426   : > { %v1806_v6 = vpop.eup %1805  ;;  %v1253_v13 = vmul.f32 %v1804_v8, %v2568_v61 }
 0x427   : > { %v1808_v10 = vpop.eup %1807  ;;  %v1254_v12 = vmul.f32 %v1806_v6, %v1790_v7 }
 0x428   : > { %v1255_v29 = vmul.f32 %v1808_v10, %v1792_v11 }
 0x429   : > { %v1258_v57 = vpack.c.bf16 %v1254_v12, %v1252_v9  ;;  %v1270_v42 = vpop.permute.xlu1 %1269 }
 0x42a   : > { %v1259_v16 = vpack.c.bf16 %v1255_v29, %v1253_v13 }
 0x42c   : > { %1284 = vmatprep.subr.bf16.mxu0 %v1259_v16 }
 0x42d   : > { %1285 = vmatpush1.bf16.msra.mxu0 %v1258_v57 }
 0x430   : > { %1543 = vmatmul.mubr.msk.bf16.vlgmr.msra.gmra.mrb[8].mxu0 %vm564_vm0, %v971_v51 }
 0x431   : > { %1324 = vmatprep.mubr.bf16.mxu0 %v2055_v45 }
 0x438   : > { %1544 = vmatmul.mubr.msk.bf16.gmra.mrb[12].mxu0 %vm564_vm0, %v972_v44 }
 0x503   : > { %v1316_v33 = vpop.f32.mrb[8].mxu0 }
 0x504   : > { %v1317_v61 = vadd.f32 %v1316_v33, %v1262_v31  ;;  %v1318_v7 = vpop.f32.mrb[9].mxu0 }
 0x505   : > { %v1319_v11 = vadd.f32 %v1318_v7, %v1262_v31  ;;  %v1320_v14 = vpop.f32.mrb[10].mxu0 }
 0x506   : > { %v1335_v15 = vadd.f32 %v1317_v61, %v2424_v47  ;;  %v1321_v40 = vadd.f32 %v1320_v14, %v1266_v56  ;;  %v1322_v46 = vpop.f32.mrb[11].mxu0 }
 0x507   : > { %v1336_v51 = vadd.f32 %v1319_v11, %v2430_v49  ;;  %v1323_v59 = vadd.f32 %v1322_v46, %v1266_v56 }
 0x508   : > { %1343 = vst [vmem:[%s464_s19] sm:$0xff] %v1335_v15  ;;  %v1337_v45 = vadd.f32 %v1321_v40, %v2427_v48 }
 0x509   : > { %1344 = vst [vmem:[%s464_s19 + $0x8] sm:$0xff] %v1336_v51  ;;  %v1338_v39 = vadd.f32 %v1323_v59, %v2433_v50 }
 0x50a   : > { %1345 = vst [vmem:[%s464_s19 + $0x10] sm:$0xff] %v1337_v45 }
 0x50b   : > { %1346 = vst [vmem:[%s464_s19 + $0x18] sm:$0xff] %v1338_v39  ;;  %v1326_v44 = vpop.f32.mrb[12].mxu0 }
 0x50c   : > { %v1327_v47 = vadd.f32 %v1326_v44, %v1270_v42  ;;  %v1328_v17 = vpop.f32.mrb[13].mxu0 }
 0x50d   : > { %v1329_v63 = vadd.f32 %v1328_v17, %v1270_v42  ;;  %v1330_v49 = vpop.f32.mrb[14].mxu0 }
 0x50e   : > { %v1339_v19 = vadd.f32 %v1327_v47, %v2442_v54  ;;  %v1331_v20 = vadd.f32 %v1330_v49, %v1274_v18  ;;  %v1332_v48 = vpop.f32.mrb[15].mxu0 }
 0x50f   : > { %v1340_v50 = vadd.f32 %v1329_v63, %v2451_v58  ;;  %v1333_v21 = vadd.f32 %v1332_v48, %v1274_v18 }
 0x510   : > { %1347 = vst [vmem:[%s464_s19 + $0x20] sm:$0xff] %v1339_v19  ;;  %v1341_v4 = vadd.f32 %v1331_v20, %v2457_v62 }
 0x511   : > { %1348 = vst [vmem:[%s464_s19 + $0x28] sm:$0xff] %v1340_v50  ;;  %v1342_v54 = vadd.f32 %v1333_v21, %v2463_v2 }
 0x512   : > { %1349 = vst [vmem:[%s464_s19 + $0x30] sm:$0xff] %v1341_v4 }
 0x513   : > { %1350 = vst [vmem:[%s464_s19 + $0x38] sm:$0xff] %v1342_v54 }
 0x514   : > { %1964 = shalt.err (!%p1961_p10)
}
 0x515   : > { %s1965_s6 = scalar_lea.hbm %s2604_s16, 1024  ;;  %s1969_s19 = scalar_lea.hbm %s2698_s21, 2048 }
 0x516   : > { %p1966_p13 = scmp.ne.s32.totalorder %s2604_s16, %s1965_s6  ;;  %p1970_p7 = scmp.lt.u32.totalorder %s2604_s16, %s2698_s21 }
 0x517   : > { %p1971_p11 = scmp.lt.u32.totalorder %s1969_s19, %s1965_s6  ;;  %p1973_p1 = scmp.lt.u32.totalorder %s1965_s6, %s2604_s16 }
 0x518   : > { %p1967_p9 = pnand %p1966_p13, %p2290_p6 }
 0x519   : > { %p1972_p12 = por %p1971_p11, %p1970_p7 }
 0x51a   : > { %p1968_p3 = pneg %p1967_p9 }
 0x51b   : > { %p1974_p2 = por %p1973_p1, %p1972_p12 }
 0x51d   : > { %p1975_p4 = pnand %p1974_p2, %p1968_p3 }
 0x51f   : > { %1978 = shalt.err (!%p1975_p4)
}
 0x520   : > { %s2059_s13 = smov 256   ;;  %s2060_s26 = smov 16  }
 0x521   : > { %1648 = dma.vmem_to_hbm [thread:$0]  (%p2290_p6), %s2597_s9, 1024, %s2604_s16, %s1352_s12, %s2059_s13, %s2059_s13, %s2060_s26  }
 0x522 PF: > { %s2699_s29 = sld [smem:[#allocation16_spill]]  ;;  %s2700_s11 = sld [smem:[#allocation17_spill]] }
 0x523   : > { %p2702_p0 = scmp.ge.s32.totalorder %s2041_s18, 2 }
 0x528   : > { %s1382_s22 = sand.u32 1, %s2699_s29   ;;  %p2701_p8 = scmp.ne.s32.totalorder %s2700_s11, 0 }
 0x529   : > { %s1383_s6 = scalar_lea.sflag [#allocation4], %s1382_s22 }
 0x52a   : > { %p1668_p5 = pnand %p2702_p0, %p2701_p8 }
 0x52c   : > { %2016 = dma.done.wait (!%p1668_p5), %s1383_s6, 1024  }
 0x52d   : > { %2018 = vsyncadd (!%p1668_p5), %s1383_s6, 4294966272  ;;  %s28_s18 = sadd.s32 1, %s2041_s18   ;;  %s2703_s13 = smov %s2025_s14 }
 0x52e   : > { %p25_p10 = scmp.ge.s32.totalorder %s28_s18, 4   ;;  %s2704_s14 = smov %s2029_s15 }
 0x52f   : > { %s2705_s15 = smov %s2299_s20  ;;  %s2706_s16 = smov %s2037_s17 }
 0x530   : > { %s2707_s17 = smov %s2709_s10  ;;  %27 = sbr.rel (!%p25_p10) target bundleno = 14 (0xe), region = 124 }
 0x537   :  { %1388 = vsyncpa [#allocation3], 1 }
 0x538   :  { %1390 = vsyncpa [#allocation3 + $0x1], 1 }
 0x539   :  { %1391 = vsyncpa [#allocation6], 1 }
 0x53a   :  { %1392 = vsyncpa [#allocation9], 1 }
 0x53b   :  { %1393 = vsyncpa [#allocation4], 1 }
 0x53c   :  { %1395 = vsyncpa [#allocation4 + $0x1], 1 }

</bundles_post_ra>
